<compile_context>
chip_gen: v7x
topology: tpu7x:2x2x1
jax: 0.10.0
libtpu: 0.0.40
codegen_flags: <defaults>
</compile_context>

<pallas_src>
import jax
import jax.numpy as jnp
from jax.experimental import pallas as pl
from jax.experimental.pallas import tpu as pltpu

_EPS = 1e-5                      # torch.nn.LayerNorm default eps
_INV_SQRT2 = 0.7071067811865476


def _gelu(x):
    # exact (erf-based) GELU, matching torch.nn.GELU() default
    return 0.5 * x * (1.0 + jax.lax.erf(x * _INV_SQRT2))


def _layernorm_ch(h, w, b):
    # LayerNorm over the channel (sublane) axis of a (C, B_tile) slab.
    mu = jnp.mean(h, axis=0, keepdims=True)
    var = jnp.mean((h - mu) ** 2, axis=0, keepdims=True)
    return (h - mu) * jax.lax.rsqrt(var + _EPS) * w + b


def _matmul_bias(w_bf16, h, b_f32):
    # (Cout, Cin) bf16 @ (Cin, B_tile) bf16 -> f32 accumulation, f32 bias add.
    return jnp.dot(w_bf16, h.astype(jnp.bfloat16),
                   preferred_element_type=jnp.float32) + b_f32


def _block_apply(h, pre, w_in, b_in, w_out, post, w_ds=None):
    """One InvResX1D block (kernel=1, stride=1, groups=1) on a (C, B_tile) slab.

    pre  = [dw_w | dw_b | ln_w | ln_b]     (indim, 4)   f32
    post = [b_out]                         (outdim, 1)  f32  (identity residual)
         = [b_out | b_ds | ln2_w | ln2_b]  (outdim, 4)  f32  (downsample residual)
    """
    out = h * pre[:, 0:1] + pre[:, 1:2]                  # depthwise Conv1d(k=1, groups=C)
    out = _layernorm_ch(out, pre[:, 2:3], pre[:, 3:4])   # LayerNorm over channels
    out = _gelu(_matmul_bias(w_in, out, b_in))           # pt_wise_in + GELU
    out = _matmul_bias(w_out, out, post[:, 0:1])         # pt_wise_out
    if w_ds is not None:
        ident = _matmul_bias(w_ds, h, post[:, 1:2])               # downsample 1x1 conv
        ident = _layernorm_ch(ident, post[:, 2:3], post[:, 3:4])  # out_norm
    else:
        ident = h
    return _gelu(out + ident)


def _flatten_params(params):
    flat = []
    for p in params["blocks"]:
        flat += [p["pre"], p["w_in"], p["b_in"], p["w_out"], p["post"]]
        if "w_ds" in p:
            flat.append(p["w_ds"])
    flat += [params["fc_w"], params["fc_b"]]
    return flat


def _make_fused_kernel(has_ds_flags):
    """Builds the fused kernel body for a statically-known block structure."""
    def kernel(x_ref, *refs):
        o_ref = refs[-1]
        prefs = refs[:-1]
        h = x_ref[...]                                   # (indim, tile_b) f32
        idx = 0
        for has_ds in has_ds_flags:
            pre = prefs[idx][...]
            w_in = prefs[idx + 1][...]
            b_in = prefs[idx + 2][...]
            w_out = prefs[idx + 3][...]
            post = prefs[idx + 4][...]
            idx += 5
            w_ds = None
            if has_ds:
                w_ds = prefs[idx][...]
                idx += 1
            h = _block_apply(h, pre, w_in, b_in, w_out, post, w_ds)
        fc_w = prefs[idx][...]
        fc_b = prefs[idx + 1][...]
        o_ref[...] = _matmul_bias(fc_w, h, fc_b)         # fc_out: nn.Linear
    return kernel


def _weight_spec(shape):
    # Constant index_map -> fetched once, resident across the batch grid.
    # Single-buffered (pl.Buffered(1)) where supported: constant blocks are
    # never re-fetched, so default double-buffering only wastes VMEM (v7x has
    # 64 MiB physical / 32 MiB scoped default).
    idx_map = lambda i: (0, 0)           # all flattened params are 2-D by construction
    buffered = getattr(pl, "Buffered", None)
    if buffered is not None:
        try:
            return pl.BlockSpec(shape, idx_map, pipeline_mode=buffered(1))
        except TypeError:                # older jax without pipeline_mode kwarg
            pass
    return pl.BlockSpec(shape, idx_map)


def _padded_vmem_bytes(shape, dtype, bufs=1):
    # (8,128) f32 / (16,128) bf16 tile-padded VMEM footprint of a 2-D operand.
    r, c = shape
    itemsize = jnp.dtype(dtype).itemsize
    sub = 8 * (4 // itemsize)
    return (-(-r // sub) * sub) * (-(-c // 128) * 128) * itemsize * bufs


@jax.jit
def deep_mlp_forward(x, params):
    B, indim = x.shape
    outdim = params["fc_w"].shape[0]
    flags = tuple("w_ds" in p for p in params["blocks"])
    flat = _flatten_params(params)

    # Batch tile = lane axis: multiple of 128, as large as the batch warrants.
    if B <= 128:
        tile_b = 128
    elif B <= 256:
        tile_b = 256
    else:
        tile_b = 512
    ntiles = -(-B // tile_b)
    if ntiles > 1 and ntiles % 2:
        ntiles += 1                      # even grid -> v7x megacore splits evenly
    Bp = ntiles * tile_b

    # channels-on-sublanes / batch-on-lanes layout (layout plumbing only).
    xt = jnp.pad(x.T, ((0, 0), (0, Bp - B)))             # (indim, Bp) f32

    # Explicit VMEM budget: weights (conservatively 2 buffers) + pipelined
    # activation tiles + headroom for the widest f32 intermediates.
    max_rows = max([indim, outdim] + [p["w_in"].shape[0] for p in params["blocks"]])
    vmem_bytes = (sum(_padded_vmem_bytes(a.shape, a.dtype, 2) for a in flat)
                  + _padded_vmem_bytes((indim, tile_b), jnp.float32, 2)
                  + _padded_vmem_bytes((outdim, tile_b), jnp.float32, 2)
                  + 4 * _padded_vmem_bytes((max_rows, tile_b), jnp.float32, 1)
                  + (2 << 20))
    vmem_bytes = int(min(max(vmem_bytes, 4 << 20), 64 << 20))

    # Advisory cost estimate for XLA's scheduler.
    flops, trans = 0, 0
    for p in params["blocks"]:
        e, ci = p["w_in"].shape
        co = p["w_out"].shape[0]
        flops += 2 * Bp * (ci * e + e * co)
        trans += Bp * (e + co)                           # two GELUs per block
        if "w_ds" in p:
            flops += 2 * Bp * ci * co
    flops += 2 * Bp * params["fc_w"].shape[1] * outdim
    bytes_accessed = (xt.size * 4 + Bp * outdim * 4
                      + sum(a.size * a.dtype.itemsize for a in flat))

    in_specs = [pl.BlockSpec((indim, tile_b), lambda i: (0, i))]
    in_specs += [_weight_spec(a.shape) for a in flat]

    out = pl.pallas_call(
        _make_fused_kernel(flags),
        grid=(ntiles,),
        in_specs=in_specs,
        out_specs=pl.BlockSpec((outdim, tile_b), lambda i: (0, i)),
        out_shape=jax.ShapeDtypeStruct((outdim, Bp), jnp.float32),
        compiler_params=pltpu.CompilerParams(
            dimension_semantics=("parallel",),
            vmem_limit_bytes=vmem_bytes),
        cost_estimate=pl.CostEstimate(flops=flops, transcendentals=trans,
                                      bytes_accessed=bytes_accessed),
    )(xt, *flat)
    return out[:, :B].T                                  # back to (B, outdim)


# ---------------------------------------------------------------------------
# Deterministic parameter construction (shapes follow the PyTorch __init__).
# Conv/Linear weights are stored as (Cout, Cin) bf16 so the kernel computes
# W @ h on the MXU in the transposed layout; per-channel vectors are packed
# into (C, cols) f32 slabs that broadcast along the lane (batch) axis.
# ---------------------------------------------------------------------------
def _init_block(key, indim, outdim, expansion_fact):
    ks = jax.random.split(key, 12)
    e = expansion_fact * indim
    dw_w = 1.0 + 0.5 * jax.random.normal(ks[0], (indim, 1), jnp.float32)
    dw_b = 0.1 * jax.random.normal(ks[1], (indim, 1), jnp.float32)
    ln_w = 1.0 + 0.1 * jax.random.normal(ks[2], (indim, 1), jnp.float32)
    ln_b = 0.1 * jax.random.normal(ks[3], (indim, 1), jnp.float32)
    p = dict(
        pre=jnp.concatenate([dw_w, dw_b, ln_w, ln_b], axis=1),
        w_in=(jax.random.normal(ks[4], (e, indim), jnp.float32)
              / jnp.sqrt(indim)).astype(jnp.bfloat16),
        b_in=0.1 * jax.random.normal(ks[5], (e, 1), jnp.float32),
        w_out=(jax.random.normal(ks[6], (outdim, e), jnp.float32)
               / jnp.sqrt(e)).astype(jnp.bfloat16),
    )
    b_out = 0.1 * jax.random.normal(ks[7], (outdim, 1), jnp.float32)
    if indim != outdim:  # stride is always 1 in DeepMLP
        b_ds = 0.1 * jax.random.normal(ks[9], (outdim, 1), jnp.float32)
        ln2_w = 1.0 + 0.1 * jax.random.normal(ks[10], (outdim, 1), jnp.float32)
        ln2_b = 0.1 * jax.random.normal(ks[11], (outdim, 1), jnp.float32)
        p["post"] = jnp.concatenate([b_out, b_ds, ln2_w, ln2_b], axis=1)
        p["w_ds"] = (jax.random.normal(ks[8], (outdim, indim), jnp.float32)
                     / jnp.sqrt(indim)).astype(jnp.bfloat16)
    else:
        p["post"] = b_out
    return p


def init_deep_mlp(key, indim, outdim, layers=(1, 1, 1, 1), expansion_fact=1):
    dims = [(max(int(indim / 2 ** i), outdim), max(int(indim / 2 ** (i + 1)), outdim))
            if i > 0 else (indim, max(int(indim / 2 ** (i + 1)), outdim))
            for i in range(len(layers))]
    block_dims = []
    for nblocks, (i, j) in zip(layers, dims):
        block_dims += [(i, i)] * (nblocks - 1) + [(i, j)]
    keys = jax.random.split(key, len(block_dims) + 2)
    blocks = [_init_block(k, i, j, expansion_fact)
              for k, (i, j) in zip(keys[:len(block_dims)], block_dims)]
    fc_in = max(int(indim / 2 ** len(layers)), outdim)
    fc_w = (jax.random.normal(keys[-2], (outdim, fc_in), jnp.float32)
            / jnp.sqrt(fc_in)).astype(jnp.bfloat16)
    fc_b = 0.1 * jax.random.normal(keys[-1], (outdim, 1), jnp.float32)
    return {"blocks": blocks, "fc_w": fc_w, "fc_b": fc_b}


# ---------------------------------------------------------------------------
# Pure-JAX reference (identical math — same bf16-weight matmuls with f32
# accumulation, same f32 elementwise path, same transposed layout).
# ---------------------------------------------------------------------------
def _ref_forward(x, params):
    h = x.T
    for p in params["blocks"]:
        h = _block_apply(h, p["pre"], p["w_in"], p["b_in"], p["w_out"],
                         p["post"], p.get("w_ds"))
    return _matmul_bias(params["fc_w"], h, params["fc_b"]).T


if __name__ == "__main__":
    key = jax.random.PRNGKey(0)
    kx, kp = jax.random.split(key)

    B, INDIM, OUTDIM = 8, 32, 8           # small shapes; x is (B, indim)
    params = init_deep_mlp(kp, INDIM, OUTDIM, layers=(1, 1, 1, 1), expansion_fact=1)
    x = jax.random.normal(kx, (B, INDIM), dtype=jnp.float32)

    y = deep_mlp_forward(x, params)
    jax.block_until_ready(y)

    y_ref = _ref_forward(x, params)
    assert y.shape == (B, OUTDIM), y.shape
    assert jnp.allclose(y, y_ref, atol=2e-3, rtol=2e-3), float(jnp.max(jnp.abs(y - y_ref)))
    print("KERNEL_OK")
</pallas_src>

<mosaic_0001>
module attributes {stable_mosaic.version = 11 : i64} {
  func.func @kernel(%arg0: i32, %arg1: memref<32x128xf32, #tpu.memory_space<vmem>>, %arg2: memref<32x4xf32, #tpu.memory_space<vmem>>, %arg3: memref<32x32xbf16, #tpu.memory_space<vmem>>, %arg4: memref<32x1xf32, #tpu.memory_space<vmem>>, %arg5: memref<16x32xbf16, #tpu.memory_space<vmem>>, %arg6: memref<16x4xf32, #tpu.memory_space<vmem>>, %arg7: memref<16x32xbf16, #tpu.memory_space<vmem>>, %arg8: memref<16x4xf32, #tpu.memory_space<vmem>>, %arg9: memref<16x16xbf16, #tpu.memory_space<vmem>>, %arg10: memref<16x1xf32, #tpu.memory_space<vmem>>, %arg11: memref<8x16xbf16, #tpu.memory_space<vmem>>, %arg12: memref<8x4xf32, #tpu.memory_space<vmem>>, %arg13: memref<8x16xbf16, #tpu.memory_space<vmem>>, %arg14: memref<8x4xf32, #tpu.memory_space<vmem>>, %arg15: memref<8x8xbf16, #tpu.memory_space<vmem>>, %arg16: memref<8x1xf32, #tpu.memory_space<vmem>>, %arg17: memref<8x8xbf16, #tpu.memory_space<vmem>>, %arg18: memref<8x1xf32, #tpu.memory_space<vmem>>, %arg19: memref<8x4xf32, #tpu.memory_space<vmem>>, %arg20: memref<8x8xbf16, #tpu.memory_space<vmem>>, %arg21: memref<8x1xf32, #tpu.memory_space<vmem>>, %arg22: memref<8x8xbf16, #tpu.memory_space<vmem>>, %arg23: memref<8x1xf32, #tpu.memory_space<vmem>>, %arg24: memref<8x8xbf16, #tpu.memory_space<vmem>>, %arg25: memref<8x1xf32, #tpu.memory_space<vmem>>, %arg26: memref<8x128xf32, #tpu.memory_space<vmem>>) attributes {dimension_semantics = [#tpu.dimension_semantics<parallel>], iteration_bounds = array<i64: 1>, scalar_prefetch = 0 : i64, scratch_operands = 0 : i64, tpu.core_type = #tpu.core_type<tc>, window_params = [{transform_indices = @transform_0, window_bounds = array<i64: 32, 128>}, {pipeline_mode = #tpu.pipeline_mode<synchronous>, transform_indices = @transform_1, window_bounds = array<i64: 32, 4>}, {pipeline_mode = #tpu.pipeline_mode<synchronous>, transform_indices = @transform_2, window_bounds = array<i64: 32, 32>}, {pipeline_mode = #tpu.pipeline_mode<synchronous>, transform_indices = @transform_3, window_bounds = array<i64: 32, 1>}, {pipeline_mode = #tpu.pipeline_mode<synchronous>, transform_indices = @transform_4, window_bounds = array<i64: 16, 32>}, {pipeline_mode = #tpu.pipeline_mode<synchronous>, transform_indices = @transform_5, window_bounds = array<i64: 16, 4>}, {pipeline_mode = #tpu.pipeline_mode<synchronous>, transform_indices = @transform_6, window_bounds = array<i64: 16, 32>}, {pipeline_mode = #tpu.pipeline_mode<synchronous>, transform_indices = @transform_7, window_bounds = array<i64: 16, 4>}, {pipeline_mode = #tpu.pipeline_mode<synchronous>, transform_indices = @transform_8, window_bounds = array<i64: 16, 16>}, {pipeline_mode = #tpu.pipeline_mode<synchronous>, transform_indices = @transform_9, window_bounds = array<i64: 16, 1>}, {pipeline_mode = #tpu.pipeline_mode<synchronous>, transform_indices = @transform_10, window_bounds = array<i64: 8, 16>}, {pipeline_mode = #tpu.pipeline_mode<synchronous>, transform_indices = @transform_11, window_bounds = array<i64: 8, 4>}, {pipeline_mode = #tpu.pipeline_mode<synchronous>, transform_indices = @transform_12, window_bounds = array<i64: 8, 16>}, {pipeline_mode = #tpu.pipeline_mode<synchronous>, transform_indices = @transform_13, window_bounds = array<i64: 8, 4>}, {pipeline_mode = #tpu.pipeline_mode<synchronous>, transform_indices = @transform_14, window_bounds = array<i64: 8, 8>}, {pipeline_mode = #tpu.pipeline_mode<synchronous>, transform_indices = @transform_15, window_bounds = array<i64: 8, 1>}, {pipeline_mode = #tpu.pipeline_mode<synchronous>, transform_indices = @transform_16, window_bounds = array<i64: 8, 8>}, {pipeline_mode = #tpu.pipeline_mode<synchronous>, transform_indices = @transform_17, window_bounds = array<i64: 8, 1>}, {pipeline_mode = #tpu.pipeline_mode<synchronous>, transform_indices = @transform_18, window_bounds = array<i64: 8, 4>}, {pipeline_mode = #tpu.pipeline_mode<synchronous>, transform_indices = @transform_19, window_bounds = array<i64: 8, 8>}, {pipeline_mode = #tpu.pipeline_mode<synchronous>, transform_indices = @transform_20, window_bounds = array<i64: 8, 1>}, {pipeline_mode = #tpu.pipeline_mode<synchronous>, transform_indices = @transform_21, window_bounds = array<i64: 8, 8>}, {pipeline_mode = #tpu.pipeline_mode<synchronous>, transform_indices = @transform_22, window_bounds = array<i64: 8, 1>}, {pipeline_mode = #tpu.pipeline_mode<synchronous>, transform_indices = @transform_23, window_bounds = array<i64: 8, 8>}, {pipeline_mode = #tpu.pipeline_mode<synchronous>, transform_indices = @transform_24, window_bounds = array<i64: 8, 1>}, {transform_indices = @transform_25, window_bounds = array<i64: 8, 128>}]} {
    %c0 = arith.constant 0 : index
    %c0_0 = arith.constant 0 : index
    %0 = vector.load %arg1[%c0, %c0_0] : memref<32x128xf32, #tpu.memory_space<vmem>>, vector<32x128xf32>
    %c0_1 = arith.constant 0 : index
    %c0_2 = arith.constant 0 : index
    %1 = vector.load %arg2[%c0_1, %c0_2] : memref<32x4xf32, #tpu.memory_space<vmem>>, vector<32x4xf32>
    %c0_3 = arith.constant 0 : index
    %c0_4 = arith.constant 0 : index
    %2 = vector.load %arg3[%c0_3, %c0_4] : memref<32x32xbf16, #tpu.memory_space<vmem>>, vector<32x32xbf16>
    %c0_5 = arith.constant 0 : index
    %c0_6 = arith.constant 0 : index
    %3 = vector.load %arg4[%c0_5, %c0_6] : memref<32x1xf32, #tpu.memory_space<vmem>>, vector<32x1xf32>
    %c0_7 = arith.constant 0 : index
    %c0_8 = arith.constant 0 : index
    %4 = vector.load %arg5[%c0_7, %c0_8] : memref<16x32xbf16, #tpu.memory_space<vmem>>, vector<16x32xbf16>
    %c0_9 = arith.constant 0 : index
    %c0_10 = arith.constant 0 : index
    %5 = vector.load %arg6[%c0_9, %c0_10] : memref<16x4xf32, #tpu.memory_space<vmem>>, vector<16x4xf32>
    %c0_11 = arith.constant 0 : index
    %c0_12 = arith.constant 0 : index
    %6 = vector.load %arg7[%c0_11, %c0_12] : memref<16x32xbf16, #tpu.memory_space<vmem>>, vector<16x32xbf16>
    %7 = vector.extract_strided_slice %1 {offsets = [0, 0], sizes = [32, 1], strides = [1, 1]} : vector<32x4xf32> to vector<32x1xf32>
    %8 = vector.broadcast %7 : vector<32x1xf32> to vector<32x128xf32>
    %9 = arith.mulf %0, %8 : vector<32x128xf32>
    %10 = vector.extract_strided_slice %1 {offsets = [0, 1], sizes = [32, 1], strides = [1, 1]} : vector<32x4xf32> to vector<32x1xf32>
    %11 = vector.broadcast %10 : vector<32x1xf32> to vector<32x128xf32>
    %12 = arith.addf %9, %11 : vector<32x128xf32>
    %13 = vector.extract_strided_slice %1 {offsets = [0, 2], sizes = [32, 1], strides = [1, 1]} : vector<32x4xf32> to vector<32x1xf32>
    %14 = vector.extract_strided_slice %1 {offsets = [0, 3], sizes = [32, 1], strides = [1, 1]} : vector<32x4xf32> to vector<32x1xf32>
    %cst = arith.constant dense<0.000000e+00> : vector<128xf32>
    %15 = vector.multi_reduction <add>, %12, %cst [0] : vector<32x128xf32> to vector<128xf32>
    %16 = vector.shape_cast %15 : vector<128xf32> to vector<1x128xf32>
    %cst_13 = arith.constant 3.200000e+01 : f32
    %17 = vector.broadcast %cst_13 : f32 to vector<1x128xf32>
    %18 = arith.divf %16, %17 : vector<1x128xf32>
    %19 = vector.broadcast %18 : vector<1x128xf32> to vector<32x128xf32>
    %20 = arith.subf %12, %19 : vector<32x128xf32>
    %21 = arith.mulf %20, %20 : vector<32x128xf32>
    %cst_14 = arith.constant dense<0.000000e+00> : vector<128xf32>
    %22 = vector.multi_reduction <add>, %21, %cst_14 [0] : vector<32x128xf32> to vector<128xf32>
    %23 = vector.shape_cast %22 : vector<128xf32> to vector<1x128xf32>
    %cst_15 = arith.constant 3.200000e+01 : f32
    %24 = vector.broadcast %cst_15 : f32 to vector<1x128xf32>
    %25 = arith.divf %23, %24 : vector<1x128xf32>
    %26 = vector.broadcast %18 : vector<1x128xf32> to vector<32x128xf32>
    %27 = arith.subf %12, %26 : vector<32x128xf32>
    %cst_16 = arith.constant 9.99999974E-6 : f32
    %28 = vector.broadcast %cst_16 : f32 to vector<1x128xf32>
    %29 = arith.addf %25, %28 : vector<1x128xf32>
    %30 = math.rsqrt %29 : vector<1x128xf32>
    %31 = vector.broadcast %30 : vector<1x128xf32> to vector<32x128xf32>
    %32 = arith.mulf %27, %31 : vector<32x128xf32>
    %33 = vector.broadcast %13 : vector<32x1xf32> to vector<32x128xf32>
    %34 = arith.mulf %32, %33 : vector<32x128xf32>
    %35 = vector.broadcast %14 : vector<32x1xf32> to vector<32x128xf32>
    %36 = arith.addf %34, %35 : vector<32x128xf32>
    %37 = arith.truncf %36 : vector<32x128xf32> to vector<32x128xbf16>
    %cst_17 = arith.constant dense<0.000000e+00> : vector<32x128xf32>
    %38 = tpu.matmul %2, %37, %cst_17 {dimension_numbers = #tpu.dot_dimension_numbers<[1], [0], [0], [1], [0, 0, 1, 1], [], []>} : vector<32x32xbf16>, vector<32x128xbf16>, vector<32x128xf32> -> vector<32x128xf32>
    %39 = vector.broadcast %3 : vector<32x1xf32> to vector<32x128xf32>
    %40 = arith.addf %38, %39 : vector<32x128xf32>
    %cst_18 = arith.constant 5.000000e-01 : f32
    %41 = vector.broadcast %cst_18 : f32 to vector<32x128xf32>
    %42 = arith.mulf %41, %40 : vector<32x128xf32>
    %cst_19 = arith.constant 0.707106769 : f32
    %43 = vector.broadcast %cst_19 : f32 to vector<32x128xf32>
    %44 = arith.mulf %40, %43 : vector<32x128xf32>
    %45 = math.erf %44 : vector<32x128xf32>
    %cst_20 = arith.constant 1.000000e+00 : f32
    %46 = vector.broadcast %cst_20 : f32 to vector<32x128xf32>
    %47 = arith.addf %46, %45 : vector<32x128xf32>
    %48 = arith.mulf %42, %47 : vector<32x128xf32>
    %49 = vector.extract_strided_slice %5 {offsets = [0, 0], sizes = [16, 1], strides = [1, 1]} : vector<16x4xf32> to vector<16x1xf32>
    %50 = arith.truncf %48 : vector<32x128xf32> to vector<32x128xbf16>
    %cst_21 = arith.constant dense<0.000000e+00> : vector<16x128xf32>
    %51 = tpu.matmul %4, %50, %cst_21 {dimension_numbers = #tpu.dot_dimension_numbers<[1], [0], [0], [1], [0, 0, 1, 1], [], []>} : vector<16x32xbf16>, vector<32x128xbf16>, vector<16x128xf32> -> vector<16x128xf32>
    %52 = vector.broadcast %49 : vector<16x1xf32> to vector<16x128xf32>
    %53 = arith.addf %51, %52 : vector<16x128xf32>
    %54 = vector.extract_strided_slice %5 {offsets = [0, 1], sizes = [16, 1], strides = [1, 1]} : vector<16x4xf32> to vector<16x1xf32>
    %55 = arith.truncf %0 : vector<32x128xf32> to vector<32x128xbf16>
    %cst_22 = arith.constant dense<0.000000e+00> : vector<16x128xf32>
    %56 = tpu.matmul %6, %55, %cst_22 {dimension_numbers = #tpu.dot_dimension_numbers<[1], [0], [0], [1], [0, 0, 1, 1], [], []>} : vector<16x32xbf16>, vector<32x128xbf16>, vector<16x128xf32> -> vector<16x128xf32>
    %57 = vector.broadcast %54 : vector<16x1xf32> to vector<16x128xf32>
    %58 = arith.addf %56, %57 : vector<16x128xf32>
    %59 = vector.extract_strided_slice %5 {offsets = [0, 2], sizes = [16, 1], strides = [1, 1]} : vector<16x4xf32> to vector<16x1xf32>
    %60 = vector.extract_strided_slice %5 {offsets = [0, 3], sizes = [16, 1], strides = [1, 1]} : vector<16x4xf32> to vector<16x1xf32>
    %cst_23 = arith.constant dense<0.000000e+00> : vector<128xf32>
    %61 = vector.multi_reduction <add>, %58, %cst_23 [0] : vector<16x128xf32> to vector<128xf32>
    %62 = vector.shape_cast %61 : vector<128xf32> to vector<1x128xf32>
    %cst_24 = arith.constant 1.600000e+01 : f32
    %63 = vector.broadcast %cst_24 : f32 to vector<1x128xf32>
    %64 = arith.divf %62, %63 : vector<1x128xf32>
    %65 = vector.broadcast %64 : vector<1x128xf32> to vector<16x128xf32>
    %66 = arith.subf %58, %65 : vector<16x128xf32>
    %67 = arith.mulf %66, %66 : vector<16x128xf32>
    %cst_25 = arith.constant dense<0.000000e+00> : vector<128xf32>
    %68 = vector.multi_reduction <add>, %67, %cst_25 [0] : vector<16x128xf32> to vector<128xf32>
    %69 = vector.shape_cast %68 : vector<128xf32> to vector<1x128xf32>
    %cst_26 = arith.constant 1.600000e+01 : f32
    %70 = vector.broadcast %cst_26 : f32 to vector<1x128xf32>
    %71 = arith.divf %69, %70 : vector<1x128xf32>
    %72 = vector.broadcast %64 : vector<1x128xf32> to vector<16x128xf32>
    %73 = arith.subf %58, %72 : vector<16x128xf32>
    %cst_27 = arith.constant 9.99999974E-6 : f32
    %74 = vector.broadcast %cst_27 : f32 to vector<1x128xf32>
    %75 = arith.addf %71, %74 : vector<1x128xf32>
    %76 = math.rsqrt %75 : vector<1x128xf32>
    %77 = vector.broadcast %76 : vector<1x128xf32> to vector<16x128xf32>
    %78 = arith.mulf %73, %77 : vector<16x128xf32>
    %79 = vector.broadcast %59 : vector<16x1xf32> to vector<16x128xf32>
    %80 = arith.mulf %78, %79 : vector<16x128xf32>
    %81 = vector.broadcast %60 : vector<16x1xf32> to vector<16x128xf32>
    %82 = arith.addf %80, %81 : vector<16x128xf32>
    %83 = arith.addf %53, %82 : vector<16x128xf32>
    %cst_28 = arith.constant 5.000000e-01 : f32
    %84 = vector.broadcast %cst_28 : f32 to vector<16x128xf32>
    %85 = arith.mulf %84, %83 : vector<16x128xf32>
    %cst_29 = arith.constant 0.707106769 : f32
    %86 = vector.broadcast %cst_29 : f32 to vector<16x128xf32>
    %87 = arith.mulf %83, %86 : vector<16x128xf32>
    %88 = math.erf %87 : vector<16x128xf32>
    %cst_30 = arith.constant 1.000000e+00 : f32
    %89 = vector.broadcast %cst_30 : f32 to vector<16x128xf32>
    %90 = arith.addf %89, %88 : vector<16x128xf32>
    %91 = arith.mulf %85, %90 : vector<16x128xf32>
    %c0_31 = arith.constant 0 : index
    %c0_32 = arith.constant 0 : index
    %92 = vector.load %arg8[%c0_31, %c0_32] : memref<16x4xf32, #tpu.memory_space<vmem>>, vector<16x4xf32>
    %c0_33 = arith.constant 0 : index
    %c0_34 = arith.constant 0 : index
    %93 = vector.load %arg9[%c0_33, %c0_34] : memref<16x16xbf16, #tpu.memory_space<vmem>>, vector<16x16xbf16>
    %c0_35 = arith.constant 0 : index
    %c0_36 = arith.constant 0 : index
    %94 = vector.load %arg10[%c0_35, %c0_36] : memref<16x1xf32, #tpu.memory_space<vmem>>, vector<16x1xf32>
    %c0_37 = arith.constant 0 : index
    %c0_38 = arith.constant 0 : index
    %95 = vector.load %arg11[%c0_37, %c0_38] : memref<8x16xbf16, #tpu.memory_space<vmem>>, vector<8x16xbf16>
    %c0_39 = arith.constant 0 : index
    %c0_40 = arith.constant 0 : index
    %96 = vector.load %arg12[%c0_39, %c0_40] : memref<8x4xf32, #tpu.memory_space<vmem>>, vector<8x4xf32>
    %c0_41 = arith.constant 0 : index
    %c0_42 = arith.constant 0 : index
    %97 = vector.load %arg13[%c0_41, %c0_42] : memref<8x16xbf16, #tpu.memory_space<vmem>>, vector<8x16xbf16>
    %98 = vector.extract_strided_slice %92 {offsets = [0, 0], sizes = [16, 1], strides = [1, 1]} : vector<16x4xf32> to vector<16x1xf32>
    %99 = vector.broadcast %98 : vector<16x1xf32> to vector<16x128xf32>
    %100 = arith.mulf %91, %99 : vector<16x128xf32>
    %101 = vector.extract_strided_slice %92 {offsets = [0, 1], sizes = [16, 1], strides = [1, 1]} : vector<16x4xf32> to vector<16x1xf32>
    %102 = vector.broadcast %101 : vector<16x1xf32> to vector<16x128xf32>
    %103 = arith.addf %100, %102 : vector<16x128xf32>
    %104 = vector.extract_strided_slice %92 {offsets = [0, 2], sizes = [16, 1], strides = [1, 1]} : vector<16x4xf32> to vector<16x1xf32>
    %105 = vector.extract_strided_slice %92 {offsets = [0, 3], sizes = [16, 1], strides = [1, 1]} : vector<16x4xf32> to vector<16x1xf32>
    %cst_43 = arith.constant dense<0.000000e+00> : vector<128xf32>
    %106 = vector.multi_reduction <add>, %103, %cst_43 [0] : vector<16x128xf32> to vector<128xf32>
    %107 = vector.shape_cast %106 : vector<128xf32> to vector<1x128xf32>
    %cst_44 = arith.constant 1.600000e+01 : f32
    %108 = vector.broadcast %cst_44 : f32 to vector<1x128xf32>
    %109 = arith.divf %107, %108 : vector<1x128xf32>
    %110 = vector.broadcast %109 : vector<1x128xf32> to vector<16x128xf32>
    %111 = arith.subf %103, %110 : vector<16x128xf32>
    %112 = arith.mulf %111, %111 : vector<16x128xf32>
    %cst_45 = arith.constant dense<0.000000e+00> : vector<128xf32>
    %113 = vector.multi_reduction <add>, %112, %cst_45 [0] : vector<16x128xf32> to vector<128xf32>
    %114 = vector.shape_cast %113 : vector<128xf32> to vector<1x128xf32>
    %cst_46 = arith.constant 1.600000e+01 : f32
    %115 = vector.broadcast %cst_46 : f32 to vector<1x128xf32>
    %116 = arith.divf %114, %115 : vector<1x128xf32>
    %117 = vector.broadcast %109 : vector<1x128xf32> to vector<16x128xf32>
    %118 = arith.subf %103, %117 : vector<16x128xf32>
    %cst_47 = arith.constant 9.99999974E-6 : f32
    %119 = vector.broadcast %cst_47 : f32 to vector<1x128xf32>
    %120 = arith.addf %116, %119 : vector<1x128xf32>
    %121 = math.rsqrt %120 : vector<1x128xf32>
    %122 = vector.broadcast %121 : vector<1x128xf32> to vector<16x128xf32>
    %123 = arith.mulf %118, %122 : vector<16x128xf32>
    %124 = vector.broadcast %104 : vector<16x1xf32> to vector<16x128xf32>
    %125 = arith.mulf %123, %124 : vector<16x128xf32>
    %126 = vector.broadcast %105 : vector<16x1xf32> to vector<16x128xf32>
    %127 = arith.addf %125, %126 : vector<16x128xf32>
    %128 = arith.truncf %127 : vector<16x128xf32> to vector<16x128xbf16>
    %cst_48 = arith.constant dense<0.000000e+00> : vector<16x128xf32>
    %129 = tpu.matmul %93, %128, %cst_48 {dimension_numbers = #tpu.dot_dimension_numbers<[1], [0], [0], [1], [0, 0, 1, 1], [], []>} : vector<16x16xbf16>, vector<16x128xbf16>, vector<16x128xf32> -> vector<16x128xf32>
    %130 = vector.broadcast %94 : vector<16x1xf32> to vector<16x128xf32>
    %131 = arith.addf %129, %130 : vector<16x128xf32>
    %cst_49 = arith.constant 5.000000e-01 : f32
    %132 = vector.broadcast %cst_49 : f32 to vector<16x128xf32>
    %133 = arith.mulf %132, %131 : vector<16x128xf32>
    %cst_50 = arith.constant 0.707106769 : f32
    %134 = vector.broadcast %cst_50 : f32 to vector<16x128xf32>
    %135 = arith.mulf %131, %134 : vector<16x128xf32>
    %136 = math.erf %135 : vector<16x128xf32>
    %cst_51 = arith.constant 1.000000e+00 : f32
    %137 = vector.broadcast %cst_51 : f32 to vector<16x128xf32>
    %138 = arith.addf %137, %136 : vector<16x128xf32>
    %139 = arith.mulf %133, %138 : vector<16x128xf32>
    %140 = vector.extract_strided_slice %96 {offsets = [0, 0], sizes = [8, 1], strides = [1, 1]} : vector<8x4xf32> to vector<8x1xf32>
    %141 = arith.truncf %139 : vector<16x128xf32> to vector<16x128xbf16>
    %cst_52 = arith.constant dense<0.000000e+00> : vector<8x128xf32>
    %142 = tpu.matmul %95, %141, %cst_52 {dimension_numbers = #tpu.dot_dimension_numbers<[1], [0], [0], [1], [0, 0, 1, 1], [], []>} : vector<8x16xbf16>, vector<16x128xbf16>, vector<8x128xf32> -> vector<8x128xf32>
    %143 = vector.broadcast %140 : vector<8x1xf32> to vector<8x128xf32>
    %144 = arith.addf %142, %143 : vector<8x128xf32>
    %145 = vector.extract_strided_slice %96 {offsets = [0, 1], sizes = [8, 1], strides = [1, 1]} : vector<8x4xf32> to vector<8x1xf32>
    %146 = arith.truncf %91 : vector<16x128xf32> to vector<16x128xbf16>
    %cst_53 = arith.constant dense<0.000000e+00> : vector<8x128xf32>
    %147 = tpu.matmul %97, %146, %cst_53 {dimension_numbers = #tpu.dot_dimension_numbers<[1], [0], [0], [1], [0, 0, 1, 1], [], []>} : vector<8x16xbf16>, vector<16x128xbf16>, vector<8x128xf32> -> vector<8x128xf32>
    %148 = vector.broadcast %145 : vector<8x1xf32> to vector<8x128xf32>
    %149 = arith.addf %147, %148 : vector<8x128xf32>
    %150 = vector.extract_strided_slice %96 {offsets = [0, 2], sizes = [8, 1], strides = [1, 1]} : vector<8x4xf32> to vector<8x1xf32>
    %151 = vector.extract_strided_slice %96 {offsets = [0, 3], sizes = [8, 1], strides = [1, 1]} : vector<8x4xf32> to vector<8x1xf32>
    %cst_54 = arith.constant dense<0.000000e+00> : vector<128xf32>
    %152 = vector.multi_reduction <add>, %149, %cst_54 [0] : vector<8x128xf32> to vector<128xf32>
    %153 = vector.shape_cast %152 : vector<128xf32> to vector<1x128xf32>
    %cst_55 = arith.constant 8.000000e+00 : f32
    %154 = vector.broadcast %cst_55 : f32 to vector<1x128xf32>
    %155 = arith.divf %153, %154 : vector<1x128xf32>
    %156 = vector.broadcast %155 : vector<1x128xf32> to vector<8x128xf32>
    %157 = arith.subf %149, %156 : vector<8x128xf32>
    %158 = arith.mulf %157, %157 : vector<8x128xf32>
    %cst_56 = arith.constant dense<0.000000e+00> : vector<128xf32>
    %159 = vector.multi_reduction <add>, %158, %cst_56 [0] : vector<8x128xf32> to vector<128xf32>
    %160 = vector.shape_cast %159 : vector<128xf32> to vector<1x128xf32>
    %cst_57 = arith.constant 8.000000e+00 : f32
    %161 = vector.broadcast %cst_57 : f32 to vector<1x128xf32>
    %162 = arith.divf %160, %161 : vector<1x128xf32>
    %163 = vector.broadcast %155 : vector<1x128xf32> to vector<8x128xf32>
    %164 = arith.subf %149, %163 : vector<8x128xf32>
    %cst_58 = arith.constant 9.99999974E-6 : f32
    %165 = vector.broadcast %cst_58 : f32 to vector<1x128xf32>
    %166 = arith.addf %162, %165 : vector<1x128xf32>
    %167 = math.rsqrt %166 : vector<1x128xf32>
    %168 = vector.broadcast %167 : vector<1x128xf32> to vector<8x128xf32>
    %169 = arith.mulf %164, %168 : vector<8x128xf32>
    %170 = vector.broadcast %150 : vector<8x1xf32> to vector<8x128xf32>
    %171 = arith.mulf %169, %170 : vector<8x128xf32>
    %172 = vector.broadcast %151 : vector<8x1xf32> to vector<8x128xf32>
    %173 = arith.addf %171, %172 : vector<8x128xf32>
    %174 = arith.addf %144, %173 : vector<8x128xf32>
    %cst_59 = arith.constant 5.000000e-01 : f32
    %175 = vector.broadcast %cst_59 : f32 to vector<8x128xf32>
    %176 = arith.mulf %175, %174 : vector<8x128xf32>
    %cst_60 = arith.constant 0.707106769 : f32
    %177 = vector.broadcast %cst_60 : f32 to vector<8x128xf32>
    %178 = arith.mulf %174, %177 : vector<8x128xf32>
    %179 = math.erf %178 : vector<8x128xf32>
    %cst_61 = arith.constant 1.000000e+00 : f32
    %180 = vector.broadcast %cst_61 : f32 to vector<8x128xf32>
    %181 = arith.addf %180, %179 : vector<8x128xf32>
    %182 = arith.mulf %176, %181 : vector<8x128xf32>
    %c0_62 = arith.constant 0 : index
    %c0_63 = arith.constant 0 : index
    %183 = vector.load %arg14[%c0_62, %c0_63] : memref<8x4xf32, #tpu.memory_space<vmem>>, vector<8x4xf32>
    %c0_64 = arith.constant 0 : index
    %c0_65 = arith.constant 0 : index
    %184 = vector.load %arg15[%c0_64, %c0_65] : memref<8x8xbf16, #tpu.memory_space<vmem>>, vector<8x8xbf16>
    %c0_66 = arith.constant 0 : index
    %c0_67 = arith.constant 0 : index
    %185 = vector.load %arg16[%c0_66, %c0_67] : memref<8x1xf32, #tpu.memory_space<vmem>>, vector<8x1xf32>
    %c0_68 = arith.constant 0 : index
    %c0_69 = arith.constant 0 : index
    %186 = vector.load %arg17[%c0_68, %c0_69] : memref<8x8xbf16, #tpu.memory_space<vmem>>, vector<8x8xbf16>
    %c0_70 = arith.constant 0 : index
    %c0_71 = arith.constant 0 : index
    %187 = vector.load %arg18[%c0_70, %c0_71] : memref<8x1xf32, #tpu.memory_space<vmem>>, vector<8x1xf32>
    %188 = vector.extract_strided_slice %183 {offsets = [0, 0], sizes = [8, 1], strides = [1, 1]} : vector<8x4xf32> to vector<8x1xf32>
    %189 = vector.broadcast %188 : vector<8x1xf32> to vector<8x128xf32>
    %190 = arith.mulf %182, %189 : vector<8x128xf32>
    %191 = vector.extract_strided_slice %183 {offsets = [0, 1], sizes = [8, 1], strides = [1, 1]} : vector<8x4xf32> to vector<8x1xf32>
    %192 = vector.broadcast %191 : vector<8x1xf32> to vector<8x128xf32>
    %193 = arith.addf %190, %192 : vector<8x128xf32>
    %194 = vector.extract_strided_slice %183 {offsets = [0, 2], sizes = [8, 1], strides = [1, 1]} : vector<8x4xf32> to vector<8x1xf32>
    %195 = vector.extract_strided_slice %183 {offsets = [0, 3], sizes = [8, 1], strides = [1, 1]} : vector<8x4xf32> to vector<8x1xf32>
    %cst_72 = arith.constant dense<0.000000e+00> : vector<128xf32>
    %196 = vector.multi_reduction <add>, %193, %cst_72 [0] : vector<8x128xf32> to vector<128xf32>
    %197 = vector.shape_cast %196 : vector<128xf32> to vector<1x128xf32>
    %cst_73 = arith.constant 8.000000e+00 : f32
    %198 = vector.broadcast %cst_73 : f32 to vector<1x128xf32>
    %199 = arith.divf %197, %198 : vector<1x128xf32>
    %200 = vector.broadcast %199 : vector<1x128xf32> to vector<8x128xf32>
    %201 = arith.subf %193, %200 : vector<8x128xf32>
    %202 = arith.mulf %201, %201 : vector<8x128xf32>
    %cst_74 = arith.constant dense<0.000000e+00> : vector<128xf32>
    %203 = vector.multi_reduction <add>, %202, %cst_74 [0] : vector<8x128xf32> to vector<128xf32>
    %204 = vector.shape_cast %203 : vector<128xf32> to vector<1x128xf32>
    %cst_75 = arith.constant 8.000000e+00 : f32
    %205 = vector.broadcast %cst_75 : f32 to vector<1x128xf32>
    %206 = arith.divf %204, %205 : vector<1x128xf32>
    %207 = vector.broadcast %199 : vector<1x128xf32> to vector<8x128xf32>
    %208 = arith.subf %193, %207 : vector<8x128xf32>
    %cst_76 = arith.constant 9.99999974E-6 : f32
    %209 = vector.broadcast %cst_76 : f32 to vector<1x128xf32>
    %210 = arith.addf %206, %209 : vector<1x128xf32>
    %211 = math.rsqrt %210 : vector<1x128xf32>
    %212 = vector.broadcast %211 : vector<1x128xf32> to vector<8x128xf32>
    %213 = arith.mulf %208, %212 : vector<8x128xf32>
    %214 = vector.broadcast %194 : vector<8x1xf32> to vector<8x128xf32>
    %215 = arith.mulf %213, %214 : vector<8x128xf32>
    %216 = vector.broadcast %195 : vector<8x1xf32> to vector<8x128xf32>
    %217 = arith.addf %215, %216 : vector<8x128xf32>
    %218 = arith.truncf %217 : vector<8x128xf32> to vector<8x128xbf16>
    %cst_77 = arith.constant dense<0.000000e+00> : vector<8x128xf32>
    %219 = tpu.matmul %184, %218, %cst_77 {dimension_numbers = #tpu.dot_dimension_numbers<[1], [0], [0], [1], [0, 0, 1, 1], [], []>} : vector<8x8xbf16>, vector<8x128xbf16>, vector<8x128xf32> -> vector<8x128xf32>
    %220 = vector.broadcast %185 : vector<8x1xf32> to vector<8x128xf32>
    %221 = arith.addf %219, %220 : vector<8x128xf32>
    %cst_78 = arith.constant 5.000000e-01 : f32
    %222 = vector.broadcast %cst_78 : f32 to vector<8x128xf32>
    %223 = arith.mulf %222, %221 : vector<8x128xf32>
    %cst_79 = arith.constant 0.707106769 : f32
    %224 = vector.broadcast %cst_79 : f32 to vector<8x128xf32>
    %225 = arith.mulf %221, %224 : vector<8x128xf32>
    %226 = math.erf %225 : vector<8x128xf32>
    %cst_80 = arith.constant 1.000000e+00 : f32
    %227 = vector.broadcast %cst_80 : f32 to vector<8x128xf32>
    %228 = arith.addf %227, %226 : vector<8x128xf32>
    %229 = arith.mulf %223, %228 : vector<8x128xf32>
    %230 = arith.truncf %229 : vector<8x128xf32> to vector<8x128xbf16>
    %cst_81 = arith.constant dense<0.000000e+00> : vector<8x128xf32>
    %231 = tpu.matmul %186, %230, %cst_81 {dimension_numbers = #tpu.dot_dimension_numbers<[1], [0], [0], [1], [0, 0, 1, 1], [], []>} : vector<8x8xbf16>, vector<8x128xbf16>, vector<8x128xf32> -> vector<8x128xf32>
    %232 = vector.broadcast %187 : vector<8x1xf32> to vector<8x128xf32>
    %233 = arith.addf %231, %232 : vector<8x128xf32>
    %234 = arith.addf %233, %182 : vector<8x128xf32>
    %cst_82 = arith.constant 5.000000e-01 : f32
    %235 = vector.broadcast %cst_82 : f32 to vector<8x128xf32>
    %236 = arith.mulf %235, %234 : vector<8x128xf32>
    %cst_83 = arith.constant 0.707106769 : f32
    %237 = vector.broadcast %cst_83 : f32 to vector<8x128xf32>
    %238 = arith.mulf %234, %237 : vector<8x128xf32>
    %239 = math.erf %238 : vector<8x128xf32>
    %cst_84 = arith.constant 1.000000e+00 : f32
    %240 = vector.broadcast %cst_84 : f32 to vector<8x128xf32>
    %241 = arith.addf %240, %239 : vector<8x128xf32>
    %242 = arith.mulf %236, %241 : vector<8x128xf32>
    %c0_85 = arith.constant 0 : index
    %c0_86 = arith.constant 0 : index
    %243 = vector.load %arg19[%c0_85, %c0_86] : memref<8x4xf32, #tpu.memory_space<vmem>>, vector<8x4xf32>
    %c0_87 = arith.constant 0 : index
    %c0_88 = arith.constant 0 : index
    %244 = vector.load %arg20[%c0_87, %c0_88] : memref<8x8xbf16, #tpu.memory_space<vmem>>, vector<8x8xbf16>
    %c0_89 = arith.constant 0 : index
    %c0_90 = arith.constant 0 : index
    %245 = vector.load %arg21[%c0_89, %c0_90] : memref<8x1xf32, #tpu.memory_space<vmem>>, vector<8x1xf32>
    %c0_91 = arith.constant 0 : index
    %c0_92 = arith.constant 0 : index
    %246 = vector.load %arg22[%c0_91, %c0_92] : memref<8x8xbf16, #tpu.memory_space<vmem>>, vector<8x8xbf16>
    %c0_93 = arith.constant 0 : index
    %c0_94 = arith.constant 0 : index
    %247 = vector.load %arg23[%c0_93, %c0_94] : memref<8x1xf32, #tpu.memory_space<vmem>>, vector<8x1xf32>
    %248 = vector.extract_strided_slice %243 {offsets = [0, 0], sizes = [8, 1], strides = [1, 1]} : vector<8x4xf32> to vector<8x1xf32>
    %249 = vector.broadcast %248 : vector<8x1xf32> to vector<8x128xf32>
    %250 = arith.mulf %242, %249 : vector<8x128xf32>
    %251 = vector.extract_strided_slice %243 {offsets = [0, 1], sizes = [8, 1], strides = [1, 1]} : vector<8x4xf32> to vector<8x1xf32>
    %252 = vector.broadcast %251 : vector<8x1xf32> to vector<8x128xf32>
    %253 = arith.addf %250, %252 : vector<8x128xf32>
    %254 = vector.extract_strided_slice %243 {offsets = [0, 2], sizes = [8, 1], strides = [1, 1]} : vector<8x4xf32> to vector<8x1xf32>
    %255 = vector.extract_strided_slice %243 {offsets = [0, 3], sizes = [8, 1], strides = [1, 1]} : vector<8x4xf32> to vector<8x1xf32>
    %cst_95 = arith.constant dense<0.000000e+00> : vector<128xf32>
    %256 = vector.multi_reduction <add>, %253, %cst_95 [0] : vector<8x128xf32> to vector<128xf32>
    %257 = vector.shape_cast %256 : vector<128xf32> to vector<1x128xf32>
    %cst_96 = arith.constant 8.000000e+00 : f32
    %258 = vector.broadcast %cst_96 : f32 to vector<1x128xf32>
    %259 = arith.divf %257, %258 : vector<1x128xf32>
    %260 = vector.broadcast %259 : vector<1x128xf32> to vector<8x128xf32>
    %261 = arith.subf %253, %260 : vector<8x128xf32>
    %262 = arith.mulf %261, %261 : vector<8x128xf32>
    %cst_97 = arith.constant dense<0.000000e+00> : vector<128xf32>
    %263 = vector.multi_reduction <add>, %262, %cst_97 [0] : vector<8x128xf32> to vector<128xf32>
    %264 = vector.shape_cast %263 : vector<128xf32> to vector<1x128xf32>
    %cst_98 = arith.constant 8.000000e+00 : f32
    %265 = vector.broadcast %cst_98 : f32 to vector<1x128xf32>
    %266 = arith.divf %264, %265 : vector<1x128xf32>
    %267 = vector.broadcast %259 : vector<1x128xf32> to vector<8x128xf32>
    %268 = arith.subf %253, %267 : vector<8x128xf32>
    %cst_99 = arith.constant 9.99999974E-6 : f32
    %269 = vector.broadcast %cst_99 : f32 to vector<1x128xf32>
    %270 = arith.addf %266, %269 : vector<1x128xf32>
    %271 = math.rsqrt %270 : vector<1x128xf32>
    %272 = vector.broadcast %271 : vector<1x128xf32> to vector<8x128xf32>
    %273 = arith.mulf %268, %272 : vector<8x128xf32>
    %274 = vector.broadcast %254 : vector<8x1xf32> to vector<8x128xf32>
    %275 = arith.mulf %273, %274 : vector<8x128xf32>
    %276 = vector.broadcast %255 : vector<8x1xf32> to vector<8x128xf32>
    %277 = arith.addf %275, %276 : vector<8x128xf32>
    %278 = arith.truncf %277 : vector<8x128xf32> to vector<8x128xbf16>
    %cst_100 = arith.constant dense<0.000000e+00> : vector<8x128xf32>
    %279 = tpu.matmul %244, %278, %cst_100 {dimension_numbers = #tpu.dot_dimension_numbers<[1], [0], [0], [1], [0, 0, 1, 1], [], []>} : vector<8x8xbf16>, vector<8x128xbf16>, vector<8x128xf32> -> vector<8x128xf32>
    %280 = vector.broadcast %245 : vector<8x1xf32> to vector<8x128xf32>
    %281 = arith.addf %279, %280 : vector<8x128xf32>
    %cst_101 = arith.constant 5.000000e-01 : f32
    %282 = vector.broadcast %cst_101 : f32 to vector<8x128xf32>
    %283 = arith.mulf %282, %281 : vector<8x128xf32>
    %cst_102 = arith.constant 0.707106769 : f32
    %284 = vector.broadcast %cst_102 : f32 to vector<8x128xf32>
    %285 = arith.mulf %281, %284 : vector<8x128xf32>
    %286 = math.erf %285 : vector<8x128xf32>
    %cst_103 = arith.constant 1.000000e+00 : f32
    %287 = vector.broadcast %cst_103 : f32 to vector<8x128xf32>
    %288 = arith.addf %287, %286 : vector<8x128xf32>
    %289 = arith.mulf %283, %288 : vector<8x128xf32>
    %290 = arith.truncf %289 : vector<8x128xf32> to vector<8x128xbf16>
    %cst_104 = arith.constant dense<0.000000e+00> : vector<8x128xf32>
    %291 = tpu.matmul %246, %290, %cst_104 {dimension_numbers = #tpu.dot_dimension_numbers<[1], [0], [0], [1], [0, 0, 1, 1], [], []>} : vector<8x8xbf16>, vector<8x128xbf16>, vector<8x128xf32> -> vector<8x128xf32>
    %292 = vector.broadcast %247 : vector<8x1xf32> to vector<8x128xf32>
    %293 = arith.addf %291, %292 : vector<8x128xf32>
    %294 = arith.addf %293, %242 : vector<8x128xf32>
    %cst_105 = arith.constant 5.000000e-01 : f32
    %295 = vector.broadcast %cst_105 : f32 to vector<8x128xf32>
    %296 = arith.mulf %295, %294 : vector<8x128xf32>
    %cst_106 = arith.constant 0.707106769 : f32
    %297 = vector.broadcast %cst_106 : f32 to vector<8x128xf32>
    %298 = arith.mulf %294, %297 : vector<8x128xf32>
    %299 = math.erf %298 : vector<8x128xf32>
    %cst_107 = arith.constant 1.000000e+00 : f32
    %300 = vector.broadcast %cst_107 : f32 to vector<8x128xf32>
    %301 = arith.addf %300, %299 : vector<8x128xf32>
    %302 = arith.mulf %296, %301 : vector<8x128xf32>
    %c0_108 = arith.constant 0 : index
    %c0_109 = arith.constant 0 : index
    %303 = vector.load %arg24[%c0_108, %c0_109] : memref<8x8xbf16, #tpu.memory_space<vmem>>, vector<8x8xbf16>
    %c0_110 = arith.constant 0 : index
    %c0_111 = arith.constant 0 : index
    %304 = vector.load %arg25[%c0_110, %c0_111] : memref<8x1xf32, #tpu.memory_space<vmem>>, vector<8x1xf32>
    %305 = arith.truncf %302 : vector<8x128xf32> to vector<8x128xbf16>
    %cst_112 = arith.constant dense<0.000000e+00> : vector<8x128xf32>
    %306 = tpu.matmul %303, %305, %cst_112 {dimension_numbers = #tpu.dot_dimension_numbers<[1], [0], [0], [1], [0, 0, 1, 1], [], []>} : vector<8x8xbf16>, vector<8x128xbf16>, vector<8x128xf32> -> vector<8x128xf32>
    %307 = vector.broadcast %304 : vector<8x1xf32> to vector<8x128xf32>
    %308 = arith.addf %306, %307 : vector<8x128xf32>
    %c0_113 = arith.constant 0 : index
    %c0_114 = arith.constant 0 : index
    %309 = vector.load %arg26[%c0_113, %c0_114] : memref<8x128xf32, #tpu.memory_space<vmem>>, vector<8x128xf32>
    tpu.vector_store %arg26[%c0_113, %c0_114], %308 {strides = array<i32>} : memref<8x128xf32, #tpu.memory_space<vmem>>, vector<8x128xf32>,
    return
  }
  func.func @transform_0(%arg0: i32) -> (i32, i32) {
    %c0_i32 = arith.constant 0 : i32
    %c0_i32_0 = arith.constant 0 : i32
    return %c0_i32, %arg0 : i32, i32
  }
  func.func @transform_1(%arg0: i32) -> (i32, i32) {
    %c0_i32 = arith.constant 0 : i32
    %c0_i32_0 = arith.constant 0 : i32
    %c0_i32_1 = arith.constant 0 : i32
    return %c0_i32, %c0_i32_0 : i32, i32
  }
  func.func @transform_2(%arg0: i32) -> (i32, i32) {
    %c0_i32 = arith.constant 0 : i32
    %c0_i32_0 = arith.constant 0 : i32
    %c0_i32_1 = arith.constant 0 : i32
    return %c0_i32, %c0_i32_0 : i32, i32
  }
  func.func @transform_3(%arg0: i32) -> (i32, i32) {
    %c0_i32 = arith.constant 0 : i32
    %c0_i32_0 = arith.constant 0 : i32
    %c0_i32_1 = arith.constant 0 : i32
    return %c0_i32, %c0_i32_0 : i32, i32
  }
  func.func @transform_4(%arg0: i32) -> (i32, i32) {
    %c0_i32 = arith.constant 0 : i32
    %c0_i32_0 = arith.constant 0 : i32
    %c0_i32_1 = arith.constant 0 : i32
    return %c0_i32, %c0_i32_0 : i32, i32
  }
  func.func @transform_5(%arg0: i32) -> (i32, i32) {
    %c0_i32 = arith.constant 0 : i32
    %c0_i32_0 = arith.constant 0 : i32
    %c0_i32_1 = arith.constant 0 : i32
    return %c0_i32, %c0_i32_0 : i32, i32
  }
  func.func @transform_6(%arg0: i32) -> (i32, i32) {
    %c0_i32 = arith.constant 0 : i32
    %c0_i32_0 = arith.constant 0 : i32
    %c0_i32_1 = arith.constant 0 : i32
    return %c0_i32, %c0_i32_0 : i32, i32
  }
  func.func @transform_7(%arg0: i32) -> (i32, i32) {
    %c0_i32 = arith.constant 0 : i32
    %c0_i32_0 = arith.constant 0 : i32
    %c0_i32_1 = arith.constant 0 : i32
    return %c0_i32, %c0_i32_0 : i32, i32
  }
  func.func @transform_8(%arg0: i32) -> (i32, i32) {
    %c0_i32 = arith.constant 0 : i32
    %c0_i32_0 = arith.constant 0 : i32
    %c0_i32_1 = arith.constant 0 : i32
    return %c0_i32, %c0_i32_0 : i32, i32
  }
  func.func @transform_9(%arg0: i32) -> (i32, i32) {
    %c0_i32 = arith.constant 0 : i32
    %c0_i32_0 = arith.constant 0 : i32
    %c0_i32_1 = arith.constant 0 : i32
    return %c0_i32, %c0_i32_0 : i32, i32
  }
  func.func @transform_10(%arg0: i32) -> (i32, i32) {
    %c0_i32 = arith.constant 0 : i32
    %c0_i32_0 = arith.constant 0 : i32
    %c0_i32_1 = arith.constant 0 : i32
    return %c0_i32, %c0_i32_0 : i32, i32
  }
  func.func @transform_11(%arg0: i32) -> (i32, i32) {
    %c0_i32 = arith.constant 0 : i32
    %c0_i32_0 = arith.constant 0 : i32
    %c0_i32_1 = arith.constant 0 : i32
    return %c0_i32, %c0_i32_0 : i32, i32
  }
  func.func @transform_12(%arg0: i32) -> (i32, i32) {
    %c0_i32 = arith.constant 0 : i32
    %c0_i32_0 = arith.constant 0 : i32
    %c0_i32_1 = arith.constant 0 : i32
    return %c0_i32, %c0_i32_0 : i32, i32
  }
  func.func @transform_13(%arg0: i32) -> (i32, i32) {
    %c0_i32 = arith.constant 0 : i32
    %c0_i32_0 = arith.constant 0 : i32
    %c0_i32_1 = arith.constant 0 : i32
    return %c0_i32, %c0_i32_0 : i32, i32
  }
  func.func @transform_14(%arg0: i32) -> (i32, i32) {
    %c0_i32 = arith.constant 0 : i32
    %c0_i32_0 = arith.constant 0 : i32
    %c0_i32_1 = arith.constant 0 : i32
    return %c0_i32, %c0_i32_0 : i32, i32
  }
  func.func @transform_15(%arg0: i32) -> (i32, i32) {
    %c0_i32 = arith.constant 0 : i32
    %c0_i32_0 = arith.constant 0 : i32
    %c0_i32_1 = arith.constant 0 : i32
    return %c0_i32, %c0_i32_0 : i32, i32
  }
  func.func @transform_16(%arg0: i32) -> (i32, i32) {
    %c0_i32 = arith.constant 0 : i32
    %c0_i32_0 = arith.constant 0 : i32
    %c0_i32_1 = arith.constant 0 : i32
    return %c0_i32, %c0_i32_0 : i32, i32
  }
  func.func @transform_17(%arg0: i32) -> (i32, i32) {
    %c0_i32 = arith.constant 0 : i32
    %c0_i32_0 = arith.constant 0 : i32
    %c0_i32_1 = arith.constant 0 : i32
    return %c0_i32, %c0_i32_0 : i32, i32
  }
  func.func @transform_18(%arg0: i32) -> (i32, i32) {
    %c0_i32 = arith.constant 0 : i32
    %c0_i32_0 = arith.constant 0 : i32
    %c0_i32_1 = arith.constant 0 : i32
    return %c0_i32, %c0_i32_0 : i32, i32
  }
  func.func @transform_19(%arg0: i32) -> (i32, i32) {
    %c0_i32 = arith.constant 0 : i32
    %c0_i32_0 = arith.constant 0 : i32
    %c0_i32_1 = arith.constant 0 : i32
    return %c0_i32, %c0_i32_0 : i32, i32
  }
  func.func @transform_20(%arg0: i32) -> (i32, i32) {
    %c0_i32 = arith.constant 0 : i32
    %c0_i32_0 = arith.constant 0 : i32
    %c0_i32_1 = arith.constant 0 : i32
    return %c0_i32, %c0_i32_0 : i32, i32
  }
  func.func @transform_21(%arg0: i32) -> (i32, i32) {
    %c0_i32 = arith.constant 0 : i32
    %c0_i32_0 = arith.constant 0 : i32
    %c0_i32_1 = arith.constant 0 : i32
    return %c0_i32, %c0_i32_0 : i32, i32
  }
  func.func @transform_22(%arg0: i32) -> (i32, i32) {
    %c0_i32 = arith.constant 0 : i32
    %c0_i32_0 = arith.constant 0 : i32
    %c0_i32_1 = arith.constant 0 : i32
    return %c0_i32, %c0_i32_0 : i32, i32
  }
  func.func @transform_23(%arg0: i32) -> (i32, i32) {
    %c0_i32 = arith.constant 0 : i32
    %c0_i32_0 = arith.constant 0 : i32
    %c0_i32_1 = arith.constant 0 : i32
    return %c0_i32, %c0_i32_0 : i32, i32
  }
  func.func @transform_24(%arg0: i32) -> (i32, i32) {
    %c0_i32 = arith.constant 0 : i32
    %c0_i32_0 = arith.constant 0 : i32
    %c0_i32_1 = arith.constant 0 : i32
    return %c0_i32, %c0_i32_0 : i32, i32
  }
  func.func @transform_25(%arg0: i32) -> (i32, i32) {
    %c0_i32 = arith.constant 0 : i32
    %c0_i32_0 = arith.constant 0 : i32
    return %c0_i32, %arg0 : i32, i32
  }
}

</mosaic_0001>

<bundles_post_ra>
// kernel: deep_mlp_forward.1
= control target key start
LH: loop header
LB: loop body
LE: loop exit
PB: predicated region body
PF: predicated region fallthrough
CT: control target
= control target key end

     0   :  { %v1374_v0 = vmov 0   ;;  %v1375_v4 = vmov 1   ;;  %v1376_v6 = vmov 2   ;;  %v1377_v7 = vmov 3   ;;  %s1745_s1 = inlined_call_operand.vmem [shape: f32[32,4], index: 1, kind: input, shape index: {}]   ;;  %s1746_s2 = inlined_call_operand.vmem [shape: bf16[32,32], index: 2, kind: input, shape index: {}]   ;;  %s1747_s3 = inlined_call_operand.vmem [shape: f32[32,1], index: 3, kind: input, shape index: {}]   ;;  %s1748_s6 = inlined_call_operand.vmem [shape: bf16[16,32], index: 6, kind: input, shape index: {}]   ;;  %s1749_s0 = inlined_call_operand.vmem [shape: f32[32,128], index: 0, kind: input, shape index: {}]   ;;  %s1750_s5 = inlined_call_operand.vmem [shape: f32[16,4], index: 5, kind: input, shape index: {}]   ;;  %s1751_s4 = inlined_call_operand.vmem [shape: bf16[16,32], index: 4, kind: input, shape index: {}]   ;;  %s1752_s7 = inlined_call_operand.vmem [shape: f32[16,4], index: 7, kind: input, shape index: {}]   ;;  %s1753_s8 = inlined_call_operand.vmem [shape: bf16[16,16], index: 8, kind: input, shape index: {}]   ;;  %s1754_s9 = inlined_call_operand.vmem [shape: f32[16,1], index: 9, kind: input, shape index: {}]   ;;  %s1755_s12 = inlined_call_operand.vmem [shape: bf16[8,16], index: 12, kind: input, shape index: {}]   ;;  %s1756_s11 = inlined_call_operand.vmem [shape: f32[8,4], index: 11, kind: input, shape index: {}]   ;;  %s1757_s13 = inlined_call_operand.vmem [shape: f32[8,4], index: 13, kind: input, shape index: {}]   ;;  %s1758_s10 = inlined_call_operand.vmem [shape: bf16[8,16], index: 10, kind: input, shape index: {}]   ;;  %s1759_s15 = inlined_call_operand.vmem [shape: f32[8,1], index: 15, kind: input, shape index: {}]   ;;  %s1760_s18 = inlined_call_operand.vmem [shape: f32[8,4], index: 18, kind: input, shape index: {}]   ;;  %s1761_s14 = inlined_call_operand.vmem [shape: bf16[8,8], index: 14, kind: input, shape index: {}]   ;;  %s1762_s17 = inlined_call_operand.vmem [shape: f32[8,1], index: 17, kind: input, shape index: {}]   ;;  %s1763_s16 = inlined_call_operand.vmem [shape: bf16[8,8], index: 16, kind: input, shape index: {}]   ;;  %s1764_s20 = inlined_call_operand.vmem [shape: f32[8,1], index: 20, kind: input, shape index: {}]   ;;  %s1765_s24 = inlined_call_operand.vmem [shape: f32[8,1], index: 24, kind: input, shape index: {}]   ;;  %s1766_s19 = inlined_call_operand.vmem [shape: bf16[8,8], index: 19, kind: input, shape index: {}]   ;;  %s1767_s22 = inlined_call_operand.vmem [shape: f32[8,1], index: 22, kind: input, shape index: {}]   ;;  %s1768_s21 = inlined_call_operand.vmem [shape: bf16[8,8], index: 21, kind: input, shape index: {}]   ;;  %s1769_s23 = inlined_call_operand.vmem [shape: bf16[8,8], index: 23, kind: input, shape index: {}]   ;;  %s1770_s25 = inlined_call_operand.vmem [shape: f32[8,128], index: 25, kind: output, shape index: {}]  }
   0x1   :  { %1778 = sst [smem:[#allocation2_spill]] %s1745_s1  ;;  %1289 = vset.pattern.permute.xlu1 %v1374_v0  ;;  %1288 = vset.pattern.permute.xlu0 %v1374_v0  ;;  %vm254_vm0 = vcmask 261120   ;;  %v1378_v10 = vmov 0.0   ;;  %vm1379_vm1 = vmmov 0   ;;  %vm598_vm2 = vcmask 130048  }
   0x2   :  { %1779 = sst [smem:[#allocation3_spill]] %s1746_s2  ;;  %1218 = vmatprep.subr.bf16.mxu1 %v1378_v10  ;;  %1222 = vmatprep.mubr.msk.bf16.mxu1 %vm1379_vm1, %v1378_v10  ;;  %vm841_vm3 = vcmask 1043456   ;;  %vm837_vm4 = vcmask 64512  }
   0x3   :  { %1780 = sst [smem:[#allocation4_spill]] %s1747_s3  ;;  %s1789_s28 = sld [smem:[#allocation3_spill]] }
   0x4   :  { %1781 = sst [smem:[#allocation5_spill]] %s1748_s6  ;;  %s1790_s1 = sld [smem:[#allocation4_spill]] }
   0x5   :  { %1782 = sst [smem:[#allocation6_spill]] %s1749_s0 }
   0x6   :  { %1783 = sst [smem:[#allocation7_spill]] %s1750_s5 }
   0x7   :  { %1784 = sst [smem:[#allocation8_spill]] %s1751_s4  ;;  %s1788_s4 = sld [smem:[#allocation2_spill]] }
   0x8   :  { %1785 = sst [smem:[#allocation9_spill]] %s1752_s7  ;;  %s1793_s0 = sld [smem:[#allocation7_spill]] }
   0x9   :  { %1786 = sst [smem:[#allocation10_spill]] %s1753_s8  ;;  %v1331_v8 = vld [vmem:[%s1789_s28] sm:$0xff]   ;;  %s1791_s8 = sld [smem:[#allocation6_spill]] }
   0xa   :  { %1787 = sst [smem:[#allocation11_spill]] %s1754_s9  ;;  %1214 = vmatprep.mubr.msk.bf16.mxu0 %vm254_vm0, %v1331_v8  ;;  %v93_v9 = vld [vmem:[%s1790_s1] sm:$0xff]  ;;  %v94_v11 = vld [vmem:[%s1790_s1 + $0x8] sm:$0xff]  ;;  %v95_v12 = vld [vmem:[%s1790_s1 + $0x10] sm:$0xff]  ;;  %s1794_s5 = sld [smem:[#allocation9_spill]] }
   0xb   :  { %v96_v13 = vld [vmem:[%s1790_s1 + $0x18] sm:$0xff]  ;;  %s1795_s30 = sld [smem:[#allocation8_spill]]  ;;  %s1796_s6 = sld [smem:[#allocation11_spill]] }
   0xc   :  { %s1797_s2 = sld [smem:[#allocation10_spill]] }
   0xd   :  { %v87_v1 = vld [vmem:[%s1788_s4 + $0x10] sm:$0xff]  ;;  %v85_v2 = vld [vmem:[%s1788_s4] sm:$0xff]  ;;  %v86_v3 = vld [vmem:[%s1788_s4 + $0x8] sm:$0xff] }
   0xe   :  { %115 = vperm.xlu1 %1289, %v87_v1   ;;  %105 = vperm.xlu0 %1288, %v85_v2   ;;  %v88_v5 = vld [vmem:[%s1788_s4 + $0x18] sm:$0xff] }
   0xf   :  { %v1560_v18 = vld [vmem:[%s1791_s8] sm:$0xff]  ;;  %v1565_v19 = vld [vmem:[%s1791_s8 + $0x8] sm:$0xff]  ;;  %v1572_v24 = vld [vmem:[%s1791_s8 + $0x10] sm:$0xff] }
  0x10   :  { %v1577_v25 = vld [vmem:[%s1791_s8 + $0x18] sm:$0xff] }
  0x12   :  { %1290 = vset.pattern.permute.xlu1 %v1375_v4  ;;  %110 = vperm.xlu0 %1288, %v86_v3  }
  0x13   :  { %128 = vperm.xlu1 %1290, %v85_v2  }
  0x16   :  { %1291 = vset.pattern.permute.xlu0 %v1375_v4 }
  0x17   :  { %1292 = vset.pattern.permute.xlu1 %v1374_v0  ;;  %132 = vperm.xlu0 %1291, %v86_v3  }
  0x18   :  { %120 = vperm.xlu1 %1292, %v88_v5  }
  0x1b   :  { %140 = vperm.xlu0 %1291, %v88_v5  }
  0x1c   :  { %1293 = vset.pattern.permute.xlu1 %v1375_v4 }
  0x1d   :  { %136 = vperm.xlu1 %1293, %v87_v1  }
  0x1f   :  { %1295 = vset.pattern.permute.xlu0 %v1376_v6 }
  0x20   :  { %187 = vperm.xlu0 %1295, %v86_v3  }
  0x21   :  { %1294 = vset.pattern.permute.xlu1 %v1376_v6 }
  0x22   :  { %183 = vperm.xlu1 %1294, %v85_v2  }
  0x24   :  { %191 = vperm.xlu0 %1295, %v87_v1  }
  0x26   :  { %1296 = vset.pattern.permute.xlu1 %v1377_v7 }
  0x27   :  { %203 = vperm.xlu1 %1296, %v85_v2  }
  0x28   :  { %1298 = vset.pattern.permute.xlu0 %v1377_v7 }
  0x29   :  { %211 = vperm.xlu0 %1298, %v87_v1  }
  0x2b   :  { %207 = vperm.xlu1 %1296, %v86_v3  }
  0x2d   :  { %1301 = vset.pattern.permute.xlu0 %v1374_v0 }
  0x2e   :  { %231 = vperm.xlu0 %1301, %v94_v11  }
  0x2f   :  { %1297 = vset.pattern.permute.xlu1 %v1376_v6 }
  0x30   :  { %195 = vperm.xlu1 %1297, %v88_v5  }
  0x32   :  { %1302 = vset.pattern.permute.xlu0 %v1375_v4 }
  0x34   :  { %1299 = vset.pattern.permute.xlu1 %v1377_v7 }
  0x35   :  { %215 = vperm.xlu1 %1299, %v88_v5  }
  0x39   :  { %1300 = vset.pattern.permute.xlu1 %v1374_v0 }
  0x3a   :  { %226 = vperm.xlu1 %1300, %v93_v9  }
  0x3e   :  { %236 = vperm.xlu1 %1300, %v95_v12  }
  0x42   :  { %241 = vperm.xlu1 %1300, %v96_v13  }
  0x46   :  { %1303 = vset.pattern.permute.xlu1 %v1375_v4 }
  0x8d   :  { %v116_v14 = vpop.permute.xlu1 %115  ;;  %v106_v15 = vpop.permute.xlu0 %105 }
  0x8e   :  { %v123_v21 = vmul.f32 %v106_v15, %v1560_v18  ;;  %v125_v27 = vmul.f32 %v116_v14, %v1572_v24 }
  0x91   :  { %v111_v16 = vpop.permute.xlu0 %110 }
  0x92   :  { %v129_v17 = vpop.permute.xlu1 %128  ;;  %v124_v22 = vmul.f32 %v111_v16, %v1565_v19 }
  0x93   :  { %v143_v28 = vadd.f32 %v129_v17, %v123_v21 }
  0x96   :  { %v133_v20 = vpop.permute.xlu0 %132 }
  0x97   :  { %v121_v23 = vpop.permute.xlu1 %120  ;;  %v144_v26 = vadd.f32 %v133_v20, %v124_v22 }
  0x98   :  { %v126_v29 = vmul.f32 %v121_v23, %v1577_v25 }
  0x99   :  { %v147_v32 = vadd.f32 %v144_v26, %v143_v28 }
  0x9a   :  { %v141_v30 = vpop.permute.xlu0 %140 }
  0x9b   :  { %v146_v34 = vadd.f32 %v141_v30, %v126_v29 }
  0x9c   :  { %v137_v31 = vpop.permute.xlu1 %136 }
  0x9d   :  { %v145_v33 = vadd.f32 %v137_v31, %v125_v27  ;;  %v1332_v31 = vld [vmem:[%s1789_s28 + $0x8] sm:$0xff]   ;;  %s1792_s28 = sld [smem:[#allocation5_spill]] }
  0x9f   :  { %v148_v35 = vadd.f32 %v147_v32, %v145_v33  ;;  %v188_v2 = vpop.permute.xlu0 %187  ;;  %v391_v32 = vpack.c.bf16 %v1565_v19, %v1560_v18  ;;  %v100_v18 = vld [vmem:[%s1793_s0 + $0x8] sm:$0xff]  ;;  %v99_v19 = vld [vmem:[%s1793_s0] sm:$0xff] }
  0xa0   :  { %398 = vperm.xlu1 %1303, %v100_v18   ;;  %394 = vperm.xlu0 %1302, %v99_v19  }
  0xa1   :  { %v149_v36 = vadd.f32 %v148_v35, %v146_v34  ;;  %v184_v58 = vpop.permute.xlu1 %183 }
  0xa3   :  { %v150_v37 = vrot.slane %v149_v36, 4  ;;  %v192_v5 = vpop.permute.xlu0 %191 }
  0xa4   :  { %1304 = vset.pattern.permute.xlu1 %v1376_v6  ;;  %1305 = vset.pattern.permute.xlu0 %v1376_v6 }
  0xa5   :  { %v151_v38 = vadd.f32 %v150_v37, %v149_v36  ;;  %476 = vperm.xlu1 %1304, %v99_v19   ;;  %480 = vperm.xlu0 %1305, %v100_v18  }
  0xa6   :  { %v204_v63 = vpop.permute.xlu1 %203 }
  0xa7   :  { %v152_v39 = vrot.slane %v151_v38, 2 }
  0xa8   :  { %v212_v16 = vpop.permute.xlu0 %211 }
  0xa9   :  { %v153_v40 = vadd.f32 %v152_v39, %v151_v38  ;;  %1306 = vset.pattern.permute.xlu1 %v1374_v0  ;;  %1307 = vset.pattern.permute.xlu0 %v1377_v7 }
  0xaa   :  { %v208_v3 = vpop.permute.xlu1 %207  ;;  %334 = vperm.xlu1 %1306, %v99_v19   ;;  %486 = vperm.xlu0 %1307, %v99_v19  }
  0xab   :  { %v154_v41 = vrot.slane %v153_v40, 1 }
  0xad   :  { %v155_v42 = vadd.f32 %v154_v41, %v153_v40  ;;  %v232_v40 = vpop.permute.xlu0 %231 }
  0xae   :  { %339 = vperm.xlu1 %1306, %v100_v18   ;;  %1310 = vset.pattern.permute.xlu0 %v1374_v0 }
  0xaf   :  { %v157_v43 = vmul.f32 0.03125, %v155_v42  ;;  %v196_v8 = vpop.permute.xlu1 %195 }
  0xb1   :  { %v160_v44 = vsub.f32 %v145_v33, %v157_v43  ;;  %v158_v45 = vsub.f32 %v143_v28, %v157_v43  ;;  %v159_v46 = vsub.f32 %v144_v26, %v157_v43  ;;  %v161_v47 = vsub.f32 %v146_v34, %v157_v43  ;;  %v1333_v34 = vld [vmem:[%s1792_s28] sm:$0xff]  }
  0xb2   :  { %v392_v33 = vpack.c.bf16 %v1577_v25, %v1572_v24  ;;  %1308 = vset.pattern.permute.xlu1 %v1377_v7  ;;  %v508_v24 = vld [vmem:[%s1794_s5 + $0x8] sm:$0xff]  ;;  %v507_v25 = vld [vmem:[%s1794_s5] sm:$0xff] }
  0xb3   :  { %v162_v48 = vmul.f32 %v158_v45, %v158_v45  ;;  %v163_v49 = vmul.f32 %v159_v46, %v159_v46  ;;  %v164_v50 = vmul.f32 %v160_v44, %v160_v44  ;;  %v165_v52 = vmul.f32 %v161_v47, %v161_v47  ;;  %490 = vperm.xlu1 %1308, %v100_v18  }
  0xb4   :  { %v216_v15 = vpop.permute.xlu1 %215  ;;  %523 = vperm.xlu0 %1310, %v508_v24  }
  0xb5   :  { %v166_v51 = vadd.f32 %v163_v49, %v162_v48 }
  0xb7   :  { %v167_v53 = vadd.f32 %v166_v51, %v164_v50  ;;  %1309 = vset.pattern.permute.xlu1 %v1374_v0 }
  0xb8   :  { %518 = vperm.xlu1 %1309, %v507_v25   ;;  %1312 = vset.pattern.permute.xlu0 %v1376_v6 }
  0xb9   :  { %v168_v54 = vadd.f32 %v167_v53, %v165_v52  ;;  %563 = vperm.xlu0 %1312, %v507_v25   ;;  %v227_v35 = vpop.permute.xlu1 %226 }
  0xbb   :  { %v169_v55 = vrot.slane %v168_v54, 4 }
  0xbc   :  { %1311 = vset.pattern.permute.xlu1 %v1375_v4 }
  0xbd   :  { %v170_v56 = vadd.f32 %v169_v55, %v168_v54  ;;  %529 = vperm.xlu1 %1311, %v507_v25   ;;  %1315 = vset.pattern.permute.xlu0 %v1377_v7  ;;  %v237_v36 = vpop.permute.xlu1 %236 }
  0xbe   :  { %577 = vperm.xlu0 %1315, %v508_v24  }
  0xbf   :  { %v171_v57 = vrot.slane %v170_v56, 2 }
  0xc1   :  { %v172_v59 = vadd.f32 %v171_v57, %v170_v56  ;;  %533 = vperm.xlu1 %1311, %v508_v24   ;;  %v242_v41 = vpop.permute.xlu1 %241 }
  0xc2   :  { %1317 = vset.pattern.permute.xlu0 %v1375_v4 }
  0xc3   :  { %v173_v60 = vrot.slane %v172_v59, 1 }
  0xc5   :  { %v174_v61 = vadd.f32 %v173_v60, %v172_v59  ;;  %1313 = vset.pattern.permute.xlu1 %v1376_v6 }
  0xc6   :  { %567 = vperm.xlu1 %1313, %v508_v24  }
  0xc7   :  { %v175_v62 = vmul.f32 0.03125, %v174_v61 }
  0xc9   :  { %v176_v1 = vadd.f32 1e-05, %v175_v62 }
  0xca   :  { %1314 = vset.pattern.permute.xlu1 %v1377_v7 }
  0xcb   :  { %1336 = vrsqrt.f32 %v176_v1  ;;  %573 = vperm.xlu1 %1314, %v507_v25  }
  0xcf   :  { %1316 = vset.pattern.permute.xlu1 %v1374_v0 }
  0xd5   :  { %v1337_v9 = vpop.eup %1336 }
  0xd6   :  { %v178_v11 = vmul.f32 %v1337_v9, %v158_v45  ;;  %v179_v12 = vmul.f32 %v1337_v9, %v159_v46  ;;  %v180_v13 = vmul.f32 %v1337_v9, %v160_v44  ;;  %v181_v14 = vmul.f32 %v1337_v9, %v161_v47 }
  0xd8   :  { %v198_v17 = vmul.f32 %v184_v58, %v178_v11  ;;  %v199_v20 = vmul.f32 %v188_v2, %v179_v12  ;;  %v200_v21 = vmul.f32 %v192_v5, %v180_v13  ;;  %v201_v22 = vmul.f32 %v196_v8, %v181_v14 }
  0xda   :  { %v218_v23 = vadd.f32 %v204_v63, %v198_v17  ;;  %v219_v26 = vadd.f32 %v208_v3, %v199_v20  ;;  %v221_v27 = vadd.f32 %v216_v15, %v201_v22  ;;  %v220_v28 = vadd.f32 %v212_v16, %v200_v21 }
  0xdc   :  { %v222_v29 = vpack.c.bf16 %v219_v26, %v218_v23  ;;  %v223_v30 = vpack.c.bf16 %v221_v27, %v220_v28  ;;  %v1334_v28 = vld [vmem:[%s1795_s30] sm:$0xff]  }
  0xde   :  { %1210 = vmatprep.subr.bf16.mxu0 %v222_v29 }
  0xdf   :  { %1211 = vmatpush3.bf16.msra.mxu0 %v222_v29 }
  0xe0   :  { %1212 = vmatprep.subr.bf16.mxu0 %v223_v30 }
  0xe3   :  { %1213 = vmatpush3.bf16.msra.mxu0 %v223_v30 }
  0xe4   :  { %1226 = vmatprep.subr.bf16.mxu0 %v1378_v10 }
  0xe6   :  { %1215 = vmatmul.mubr.msk.bf16.vlgmr.msra.gmra.mrb[0].mxu0 %vm254_vm0, %v1332_v31 }
  0xe7   :  { %1227 = vmatpush3.bf16.msra.mxu0 %v391_v32  ;;  %1230 = vmatprep.mubr.msk.bf16.mxu0 %vm1379_vm1, %v1378_v10 }
  0xe8   :  { %1228 = vmatprep.subr.bf16.mxu0 %v1378_v10 }
  0xeb   :  { %1229 = vmatpush3.bf16.msra.mxu0 %v392_v33 }
  0xec   :  { %1240 = vmatprep.subr.bf16.mxu0 %v1378_v10 }
  0xee   :  { %1231 = vmatmul.mubr.msk.bf16.vlgmr.msra.gmra.mrb[4].mxu0 %vm254_vm0, %v1333_v34 }
  0xef   :  { %1242 = vmatprep.mubr.msk.bf16.mxu0 %vm1379_vm1, %v1378_v10 }
 0x11f   :  { %v399_v55 = vpop.permute.xlu1 %398  ;;  %v395_v56 = vpop.permute.xlu0 %394 }
 0x1b9   :  { %v1216_v37 = vpop.f32.mrb[0].mxu0 }
 0x1ba   :  { %v304_v38 = vadd.f32 %v1216_v37, %v237_v36  ;;  %v295_v39 = vpop.f32.mrb[1].mxu0 }
 0x1bb   :  { %v296_v42 = vadd.f32 %v295_v39, %v227_v35  ;;  %v1217_v43 = vpop.f32.mrb[2].mxu0 }
 0x1bc   :  { %v316_v44 = vmul.f32 0.70710677, %v304_v38  ;;  %v307_v45 = vadd.f32 %v1217_v43, %v242_v41  ;;  %v298_v46 = vpop.f32.mrb[3].mxu0  ;;  %v312_v3 = vmul.f32 0.5, %v304_v38  ;;  %v511_v43 = vld [vmem:[%s1796_s6] sm:$0xff] }
 0x1bd   :  { %v314_v47 = vmul.f32 0.70710677, %v296_v42  ;;  %v299_v48 = vadd.f32 %v298_v46, %v232_v40  ;;  %v310_v11 = vmul.f32 0.5, %v296_v42  ;;  %585 = vperm.xlu1 %1316, %v511_v43  }
 0x1be   :  { %1338 = verf.f32 %v316_v44  ;;  %v317_v49 = vmul.f32 0.70710677, %v307_v45  ;;  %v313_v5 = vmul.f32 0.5, %v307_v45  ;;  %v512_v44 = vld [vmem:[%s1796_s6 + $0x8] sm:$0xff]  ;;  %v477_v45 = vpop.permute.xlu1 %476 }
 0x1bf   :  { %1340 = verf.f32 %v314_v47  ;;  %v315_v50 = vmul.f32 0.70710677, %v299_v48  ;;  %v311_v12 = vmul.f32 0.5, %v299_v48  ;;  %v481_v47 = vpop.permute.xlu0 %480 }
 0x1c0   :  { %1342 = verf.f32 %v317_v49 }
 0x1c1   :  { %1344 = verf.f32 %v315_v50  ;;  %v443_v51 = vpop.f32.mrb[4].mxu0  ;;  %590 = vperm.xlu1 %1316, %v512_v44  }
 0x1c2   :  { %v1232_v52 = vpop.f32.mrb[5].mxu0  ;;  %v444_v57 = vadd.f32 %v443_v51, %v395_v56  ;;  %v335_v46 = vpop.permute.xlu1 %334 }
 0x1c3   :  { %v446_v53 = vpop.f32.mrb[6].mxu0  ;;  %v487_v50 = vpop.permute.xlu0 %486 }
 0x1c4   :  { %v1233_v54 = vpop.f32.mrb[7].mxu0  ;;  %v447_v58 = vadd.f32 %v446_v53, %v399_v55 }
 0x1c5   :  { %1318 = vset.pattern.permute.xlu1 %v1376_v6 }
 0x1c6   :  { %v450_v62 = vadd.f32 %v447_v58, %v444_v57  ;;  %v340_v48 = vpop.permute.xlu1 %339 }
 0x1c8   :  { %v1339_v59 = vpop.eup %1338  ;;  %v451_v9 = vrot.slane %v450_v62, 4 }
 0x1c9   :  { %v1341_v60 = vpop.eup %1340  ;;  %v324_v61 = vadd.f32 1.0, %v1339_v59 }
 0x1ca   :  { %v1343_v63 = vpop.eup %1342  ;;  %v322_v1 = vadd.f32 1.0, %v1341_v60  ;;  %v452_v16 = vadd.f32 %v451_v9, %v450_v62  ;;  %v491_v52 = vpop.permute.xlu1 %490 }
 0x1cb   :  { %v1345_v2 = vpop.eup %1344  ;;  %v325_v8 = vadd.f32 1.0, %v1343_v63  ;;  %v328_v14 = vmul.f32 %v324_v61, %v312_v3 }
 0x1cc   :  { %v323_v13 = vadd.f32 1.0, %v1345_v2  ;;  %v326_v17 = vmul.f32 %v322_v1, %v310_v11  ;;  %v453_v22 = vrot.slane %v452_v16, 2 }
 0x1cd   :  { %v329_v15 = vmul.f32 %v325_v8, %v313_v5 }
 0x1ce   :  { %v327_v20 = vmul.f32 %v323_v13, %v311_v12  ;;  %v454_v26 = vadd.f32 %v453_v22, %v452_v16  ;;  %v519_v2 = vpop.permute.xlu1 %518 }
 0x1cf   :  { %v331_v21 = vpack.c.bf16 %v329_v15, %v328_v14  ;;  %v524_v15 = vpop.permute.xlu0 %523 }
 0x1d0   :  { %v330_v23 = vpack.c.bf16 %v327_v20, %v326_v17  ;;  %v455_v27 = vrot.slane %v454_v26, 1 }
 0x1d2   :  { %1219 = vmatpush3.bf16.msra.mxu1 %v330_v23  ;;  %v456_v29 = vadd.f32 %v455_v27, %v454_v26  ;;  %v530_v11 = vpop.permute.xlu1 %529 }
 0x1d3   :  { %1220 = vmatprep.subr.bf16.mxu1 %v1378_v10 }
 0x1d4   :  { %v458_v30 = vmul.f32 0.0625, %v456_v29 }
 0x1d6   :  { %1221 = vmatpush3.bf16.msra.mxu1 %v331_v21  ;;  %v460_v31 = vsub.f32 %v447_v58, %v458_v30  ;;  %v459_v32 = vsub.f32 %v444_v57, %v458_v30  ;;  %v534_v22 = vpop.permute.xlu1 %533 }
 0x1d7   :  { %1234 = vmatprep.subr.bf16.mxu1 %v1378_v10 }
 0x1d8   :  { %v462_v33 = vmul.f32 %v460_v31, %v460_v31  ;;  %v461_v34 = vmul.f32 %v459_v32, %v459_v32 }
 0x1d9   :  { %1223 = vmatmul.mubr.msk.bf16.vlgmr.msra.gmra.mrb[0].mxu1 %vm254_vm0, %v1334_v28 }
 0x1da   :  { %1236 = vmatprep.mubr.msk.bf16.mxu1 %vm1379_vm1, %v1378_v10  ;;  %v463_v18 = vadd.f32 %v462_v33, %v461_v34  ;;  %v568_v44 = vpop.permute.xlu1 %567 }
 0x1dc   :  { %v464_v19 = vrot.slane %v463_v18, 4 }
 0x1de   :  { %v465_v24 = vadd.f32 %v464_v19, %v463_v18 }
 0x1e0   :  { %v466_v25 = vrot.slane %v465_v24, 2 }
 0x1e2   :  { %v467_v35 = vadd.f32 %v466_v25, %v465_v24 }
 0x1e4   :  { %v468_v36 = vrot.slane %v467_v35, 1 }
 0x1e6   :  { %v469_v37 = vadd.f32 %v468_v36, %v467_v35 }
 0x1e8   :  { %v470_v38 = vmul.f32 0.0625, %v469_v37 }
 0x1ea   :  { %v471_v39 = vadd.f32 1e-05, %v470_v38 }
 0x1ec   :  { %1346 = vrsqrt.f32 %v471_v39 }
 0x1f6   :  { %v1347_v40 = vpop.eup %1346 }
 0x1f7   :  { %v473_v41 = vmul.f32 %v1347_v40, %v459_v32  ;;  %v474_v42 = vmul.f32 %v1347_v40, %v460_v31 }
 0x1f9   :  { %v483_v49 = vmul.f32 %v477_v45, %v473_v41  ;;  %v484_v51 = vmul.f32 %v481_v47, %v474_v42  ;;  %v564_v45 = vpop.permute.xlu0 %563 }
 0x1fb   :  { %v493_v54 = vadd.f32 %v487_v50, %v483_v49  ;;  %v494_v58 = vadd.f32 %v491_v52, %v484_v51  ;;  %v574_v49 = vpop.permute.xlu1 %573 }
 0x1fd   :  { %v578_v50 = vpop.permute.xlu0 %577 }
 0x2ac   :  { %v384_v53 = vpop.f32.mrb[0].mxu1 }
 0x2ad   :  { %v385_v55 = vadd.f32 %v384_v53, %v335_v46  ;;  %v1224_v56 = vpop.f32.mrb[1].mxu1 }
 0x2ae   :  { %v387_v57 = vpop.f32.mrb[2].mxu1  ;;  %v1335_v56 = vld [vmem:[%s1797_s2] sm:$0xff]  }
 0x2af   :  { %v495_v59 = vadd.f32 %v493_v54, %v385_v55  ;;  %v388_v60 = vadd.f32 %v387_v57, %v340_v48  ;;  %v1225_v61 = vpop.f32.mrb[3].mxu1  ;;  %v515_v57 = vld [vmem:[%s1755_s12] sm:$0xf] }
 0x2b1   :  { %v499_v62 = vmul.f32 0.70710677, %v495_v59  ;;  %v496_v63 = vadd.f32 %v494_v58, %v388_v60  ;;  %v497_v5 = vmul.f32 0.5, %v495_v59  ;;  %v514_v58 = vld [vmem:[%s1756_s11] sm:$0xff]  ;;  %v586_v60 = vpop.permute.xlu1 %585 }
 0x2b2   :  { %704 = vperm.xlu0 %1317, %v514_v58   ;;  %771 = vperm.xlu1 %1318, %v514_v58   ;;  %v786_v59 = vld [vmem:[%s1757_s13] sm:$0xff] }
 0x2b3   :  { %1348 = verf.f32 %v499_v62  ;;  %v500_v1 = vmul.f32 0.70710677, %v496_v63  ;;  %v498_v13 = vmul.f32 0.5, %v496_v63 }
 0x2b5   :  { %1350 = verf.f32 %v500_v1  ;;  %v591_v1 = vpop.permute.xlu1 %590 }
 0x2b6   :  { %1320 = vset.pattern.permute.xlu0 %v1377_v7  ;;  %1319 = vset.pattern.permute.xlu1 %v1374_v0 }
 0x2b7   :  { %776 = vperm.xlu0 %1320, %v514_v58   ;;  %656 = vperm.xlu1 %1319, %v514_v58  }
 0x2bb   :  { %1322 = vset.pattern.permute.xlu0 %v1376_v6  ;;  %793 = vperm.xlu1 %1319, %v786_v59  }
 0x2bc   :  { %822 = vperm.xlu0 %1322, %v786_v59  }
 0x2bd   :  { %v1349_v3 = vpop.eup %1348 }
 0x2be   :  { %v503_v8 = vadd.f32 1.0, %v1349_v3 }
 0x2bf   :  { %v1351_v9 = vpop.eup %1350  ;;  %1321 = vset.pattern.permute.xlu1 %v1375_v4 }
 0x2c0   :  { %v505_v12 = vmul.f32 %v503_v8, %v497_v5  ;;  %v504_v14 = vadd.f32 1.0, %v1351_v9  ;;  %1325 = vset.pattern.permute.xlu0 %v1374_v0  ;;  %798 = vperm.xlu1 %1321, %v786_v59  }
 0x2c2   :  { %v526_v16 = vmul.f32 %v519_v2, %v505_v12  ;;  %v506_v17 = vmul.f32 %v504_v14, %v498_v13 }
 0x2c4   :  { %v527_v20 = vmul.f32 %v524_v15, %v506_v17  ;;  %v702_v21 = vpack.c.bf16 %v506_v17, %v505_v12  ;;  %v536_v23 = vadd.f32 %v530_v11, %v526_v16  ;;  %1323 = vset.pattern.permute.xlu1 %v1377_v7 }
 0x2c5   :  { %827 = vperm.xlu1 %1323, %v786_v59  }
 0x2c6   :  { %v537_v26 = vadd.f32 %v534_v22, %v527_v20 }
 0x2c8   :  { %v538_v27 = vadd.f32 %v537_v26, %v536_v23 }
 0x2c9   :  { %1324 = vset.pattern.permute.xlu1 %v1374_v0 }
 0x2ca   :  { %v539_v28 = vrot.slane %v538_v27, 4 }
 0x2cc   :  { %v540_v29 = vadd.f32 %v539_v28, %v538_v27  ;;  %v513_v28 = vld [vmem:[%s1758_s10] sm:$0xf] }
 0x2ce   :  { %v541_v30 = vrot.slane %v540_v29, 2 }
 0x2d0   :  { %v542_v31 = vadd.f32 %v541_v30, %v540_v29 }
 0x2d2   :  { %v543_v32 = vrot.slane %v542_v31, 1 }
 0x2d4   :  { %v544_v33 = vadd.f32 %v543_v32, %v542_v31 }
 0x2d6   :  { %v545_v34 = vmul.f32 0.0625, %v544_v33 }
 0x2d8   :  { %v546_v18 = vsub.f32 %v536_v23, %v545_v34  ;;  %v547_v19 = vsub.f32 %v537_v26, %v545_v34 }
 0x2da   :  { %v548_v24 = vmul.f32 %v546_v18, %v546_v18  ;;  %v549_v25 = vmul.f32 %v547_v19, %v547_v19 }
 0x2dc   :  { %v550_v35 = vadd.f32 %v549_v25, %v548_v24 }
 0x2de   :  { %v551_v36 = vrot.slane %v550_v35, 4 }
 0x2e0   :  { %v552_v37 = vadd.f32 %v551_v36, %v550_v35 }
 0x2e2   :  { %v553_v38 = vrot.slane %v552_v37, 2 }
 0x2e4   :  { %v554_v39 = vadd.f32 %v553_v38, %v552_v37 }
 0x2e6   :  { %v555_v40 = vrot.slane %v554_v39, 1 }
 0x2e8   :  { %v556_v41 = vadd.f32 %v555_v40, %v554_v39  ;;  %v788_v39 = vld [vmem:[%s1759_s15] sm:$0xff] }
 0x2e9   :  { %834 = vperm.xlu1 %1324, %v788_v39   ;;  %v1681_v40 = vld [vmem:[%s1760_s18] sm:$0xff] }
 0x2ea   :  { %v557_v42 = vmul.f32 0.0625, %v556_v41 }
 0x2ec   :  { %v558_v43 = vadd.f32 1e-05, %v557_v42 }
 0x2ed   :  { %955 = vperm.xlu1 %1324, %v1681_v40  }
 0x2ee   :  { %1352 = vrsqrt.f32 %v558_v43 }
 0x2f1   :  { %1326 = vset.pattern.permute.xlu1 %v1375_v4 }
 0x2f2   :  { %960 = vperm.xlu1 %1326, %v1681_v40  }
 0x2f6   :  { %1328 = vset.pattern.permute.xlu1 %v1377_v7 }
 0x2f7   :  { %989 = vperm.xlu1 %1328, %v1681_v40  }
 0x2f8   :  { %v1353_v46 = vpop.eup %1352 }
 0x2f9   :  { %v561_v47 = vmul.f32 %v1353_v46, %v547_v19  ;;  %v560_v48 = vmul.f32 %v1353_v46, %v546_v18 }
 0x2fb   :  { %v571_v51 = vmul.f32 %v568_v44, %v561_v47  ;;  %v570_v52 = vmul.f32 %v564_v45, %v560_v48  ;;  %1329 = vset.pattern.permute.xlu1 %v1374_v0 }
 0x2fd   :  { %v580_v53 = vadd.f32 %v574_v49, %v570_v52  ;;  %v581_v54 = vadd.f32 %v578_v50, %v571_v51 }
 0x2ff   :  { %v582_v55 = vpack.c.bf16 %v581_v54, %v580_v53 }
 0x301   :  { %1235 = vmatpush3.bf16.msra.mxu1 %v582_v55 }
 0x302   :  { %1246 = vmatprep.subr.bf16.mxu1 %v1378_v10 }
 0x304   :  { %1237 = vmatmul.mubr.msk.bf16.vlgmr.msra.gmra.mrb[4].mxu1 %vm598_vm2, %v1335_v56 }
 0x305   :  { %1247 = vmatpush3.bf16.msra.mxu1 %v702_v21  ;;  %1248 = vmatprep.mubr.msk.bf16.mxu1 %vm1379_vm1, %v1378_v10 }
 0x306   :  { %1258 = vmatprep.subr.bf16.mxu1 %v1378_v10 }
 0x30c   :  { %1249 = vmatmul.mubr.msk.bf16.vlgmr.msra.gmra.mrb[8].mxu1 %vm598_vm2, %v515_v57 }
 0x30d   :  { %1260 = vmatprep.mubr.msk.bf16.mxu1 %vm1379_vm1, %v1378_v10 }
 0x331   :  { %v705_v29 = vpop.permute.xlu0 %704  ;;  %v772_v48 = vpop.permute.xlu1 %771 }
 0x336   :  { %v777_v50 = vpop.permute.xlu0 %776  ;;  %v657_v51 = vpop.permute.xlu1 %656 }
 0x33a   :  { %v794_v59 = vpop.permute.xlu1 %793 }
 0x3d7   :  { %v636_v61 = vpop.f32.mrb[4].mxu1 }
 0x3d8   :  { %v637_v62 = vadd.f32 %v636_v61, %v586_v60  ;;  %v1238_v63 = vpop.f32.mrb[5].mxu1 }
 0x3d9   :  { %v639_v2 = vpop.f32.mrb[6].mxu1  ;;  %v799_v63 = vpop.permute.xlu1 %798 }
 0x3da   :  { %v645_v3 = vmul.f32 0.70710677, %v637_v62  ;;  %v640_v5 = vadd.f32 %v639_v2, %v591_v1  ;;  %v1239_v8 = vpop.f32.mrb[7].mxu1  ;;  %v643_v20 = vmul.f32 0.5, %v637_v62 }
 0x3dc   :  { %1354 = verf.f32 %v645_v3  ;;  %v646_v9 = vmul.f32 0.70710677, %v640_v5  ;;  %v644_v21 = vmul.f32 0.5, %v640_v5 }
 0x3de   :  { %1356 = verf.f32 %v646_v9 }
 0x3df   :  { %v744_v11 = vpop.f32.mrb[8].mxu1 }
 0x3e0   :  { %v1250_v12 = vpop.f32.mrb[9].mxu1  ;;  %v745_v30 = vadd.f32 %v744_v11, %v705_v29  ;;  %v823_v29 = vpop.permute.xlu0 %822 }
 0x3e1   :  { %v747_v13 = vpop.f32.mrb[10].mxu1 }
 0x3e2   :  { %v1251_v14 = vpop.f32.mrb[11].mxu1  ;;  %v750_v31 = vrot.slane %v745_v30, 4 }
 0x3e4   :  { %v751_v32 = vadd.f32 %v750_v31, %v745_v30  ;;  %v828_v31 = vpop.permute.xlu1 %827 }
 0x3e6   :  { %v1355_v15 = vpop.eup %1354  ;;  %v752_v33 = vrot.slane %v751_v32, 2 }
 0x3e7   :  { %v649_v16 = vadd.f32 1.0, %v1355_v15 }
 0x3e8   :  { %v1357_v17 = vpop.eup %1356  ;;  %v753_v34 = vadd.f32 %v752_v33, %v751_v32 }
 0x3e9   :  { %v650_v22 = vadd.f32 1.0, %v1357_v17  ;;  %v651_v23 = vmul.f32 %v649_v16, %v643_v20 }
 0x3ea   :  { %v754_v18 = vrot.slane %v753_v34, 1 }
 0x3eb   :  { %v652_v26 = vmul.f32 %v650_v22, %v644_v21 }
 0x3ec   :  { %v755_v19 = vadd.f32 %v754_v18, %v753_v34 }
 0x3ed   :  { %v653_v27 = vpack.c.bf16 %v652_v26, %v651_v23 }
 0x3ee   :  { %v757_v24 = vmul.f32 0.125, %v755_v19  ;;  %v787_v19 = vld [vmem:[%s1761_s14] sm:$0xf] }
 0x3ef   :  { %1241 = vmatpush3.bf16.msra.mxu0 %v653_v27 }
 0x3f0   :  { %1252 = vmatprep.subr.bf16.mxu0 %v1378_v10  ;;  %v758_v25 = vsub.f32 %v745_v30, %v757_v24  ;;  %v790_v24 = vld [vmem:[%s1762_s17] sm:$0xff] }
 0x3f1   :  { %893 = vperm.xlu0 %1325, %v790_v24  }
 0x3f2   :  { %1243 = vmatmul.mubr.msk.bf16.vlgmr.msra.gmra.mrb[8].mxu0 %vm598_vm2, %v513_v28  ;;  %v759_v35 = vmul.f32 %v758_v25, %v758_v25 }
 0x3f3   :  { %1254 = vmatprep.mubr.msk.bf16.mxu0 %vm1379_vm1, %v1378_v10 }
 0x3f4   :  { %v760_v36 = vrot.slane %v759_v35, 4 }
 0x3f5   :  { %1327 = vset.pattern.permute.xlu0 %v1376_v6  ;;  %v950_v6 = vld [vmem:[%s1764_s20] sm:$0xff] }
 0x3f6   :  { %v761_v37 = vadd.f32 %v760_v36, %v759_v35  ;;  %984 = vperm.xlu0 %1327, %v1681_v40   ;;  %996 = vperm.xlu1 %1329, %v950_v6   ;;  %v1109_v40 = vld [vmem:[%s1765_s24] sm:$0xff] }
 0x3f8   :  { %v762_v38 = vrot.slane %v761_v37, 2 }
 0x3fa   :  { %v763_v41 = vadd.f32 %v762_v38, %v761_v37  ;;  %1330 = vset.pattern.permute.xlu0 %v1374_v0  ;;  %v789_v0 = vld [vmem:[%s1763_s16] sm:$0xf]  ;;  %1113 = vperm.xlu1 %1329, %v1109_v40  }
 0x3fc   :  { %v764_v42 = vrot.slane %v763_v41, 1 }
 0x3fe   :  { %v765_v43 = vadd.f32 %v764_v42, %v763_v41 }
 0x400   :  { %v766_v44 = vmul.f32 0.125, %v765_v43 }
 0x402   :  { %v767_v45 = vadd.f32 1e-05, %v766_v44 }
 0x404   :  { %1358 = vrsqrt.f32 %v767_v45 }
 0x40e   :  { %v1359_v46 = vpop.eup %1358 }
 0x40f   :  { %v769_v47 = vmul.f32 %v1359_v46, %v758_v25  ;;  %v835_v25 = vpop.permute.xlu1 %834 }
 0x411   :  { %v774_v49 = vmul.f32 %v772_v48, %v769_v47 }
 0x413   :  { %v779_v4 = vadd.f32 %v777_v50, %v774_v49 }
 0x470   :  { %v894_v48 = vpop.permute.xlu0 %893 }
 0x4c5   :  { %v696_v52 = vpop.f32.mrb[8].mxu0 }
 0x4c6   :  { %v697_v53 = vadd.f32 %v696_v52, %v657_v51  ;;  %v1244_v54 = vpop.f32.mrb[9].mxu0 }
 0x4c7   :  { %v699_v55 = vpop.f32.mrb[10].mxu0 }
 0x4c8   :  { %v780_v56 = vadd.f32 %v779_v4, %v697_v53  ;;  %v1245_v7 = vpop.f32.mrb[11].mxu0 }
 0x4ca   :  { %v782_v57 = vmul.f32 0.70710677, %v780_v56  ;;  %v781_v60 = vmul.f32 0.5, %v780_v56  ;;  %v956_v56 = vpop.permute.xlu1 %955 }
 0x4cc   :  { %1360 = verf.f32 %v782_v57 }
 0x4d6   :  { %v1361_v58 = vpop.eup %1360 }
 0x4d7   :  { %v784_v61 = vadd.f32 1.0, %v1361_v58 }
 0x4d9   :  { %v1689_v62 = vmul.f32 %v784_v61, %v781_v60 }
 0x4db   :  { %v796_v1 = vmul.f32 %v794_v59, %v1689_v62  ;;  %v961_v59 = vpop.permute.xlu1 %960 }
 0x4dd   :  { %v801_v2 = vadd.f32 %v799_v63, %v796_v1 }
 0x4df   :  { %v802_v3 = vrot.slane %v801_v2, 4 }
 0x4e1   :  { %v803_v5 = vadd.f32 %v802_v3, %v801_v2 }
 0x4e3   :  { %v804_v8 = vrot.slane %v803_v5, 2 }
 0x4e5   :  { %v805_v9 = vadd.f32 %v804_v8, %v803_v5 }
 0x4e7   :  { %v806_v11 = vrot.slane %v805_v9, 1 }
 0x4e9   :  { %v807_v12 = vadd.f32 %v806_v11, %v805_v9 }
 0x4eb   :  { %v808_v13 = vmul.f32 0.125, %v807_v12 }
 0x4ed   :  { %v809_v14 = vsub.f32 %v801_v2, %v808_v13 }
 0x4ef   :  { %v810_v15 = vmul.f32 %v809_v14, %v809_v14 }
 0x4f1   :  { %v811_v16 = vrot.slane %v810_v15, 4 }
 0x4f3   :  { %v812_v17 = vadd.f32 %v811_v16, %v810_v15 }
 0x4f5   :  { %v813_v20 = vrot.slane %v812_v17, 2 }
 0x4f7   :  { %v814_v21 = vadd.f32 %v813_v20, %v812_v17 }
 0x4f9   :  { %v815_v22 = vrot.slane %v814_v21, 1 }
 0x4fb   :  { %v816_v23 = vadd.f32 %v815_v22, %v814_v21 }
 0x4fd   :  { %v817_v26 = vmul.f32 0.125, %v816_v23  ;;  %v985_v23 = vpop.permute.xlu0 %984 }
 0x4ff   :  { %v818_v27 = vadd.f32 1e-05, %v817_v26 }
 0x501   :  { %1362 = vrsqrt.f32 %v818_v27  ;;  %v990_v27 = vpop.permute.xlu1 %989 }
 0x50b   :  { %v1363_v28 = vpop.eup %1362 }
 0x50c   :  { %v820_v30 = vmul.f32 %v1363_v28, %v809_v14 }
 0x50e   :  { %v825_v32 = vmul.f32 %v823_v29, %v820_v30 }
 0x510   :  { %v830_v33 = vadd.f32 %v828_v31, %v825_v32  ;;  %v949_v32 = vld [vmem:[%s1766_s19] sm:$0xf] }
 0x512   :  { %v831_v34 = vpack.c.bf16 %v830_v33, %v830_v33  ;;  %v952_v33 = vld [vmem:[%s1767_s22] sm:$0xff] }
 0x513   :  { %1053 = vperm.xlu0 %1330, %v952_v33  }
 0x514   :  { %v843_v18 = vsel %vm841_vm3, %v831_v34, 0  ;;  %v997_v34 = vpop.permute.xlu1 %996 }
 0x515   :  { %1253 = vmatpush3.bf16.msra.mxu0 %v843_v18 }
 0x516   :  { %1264 = vmatprep.subr.bf16.mxu0 %v1378_v10 }
 0x518   :  { %1255 = vmatmul.mubr.msk.bf16.vlgmr.msra.gmra.mrb[12].mxu0 %vm837_vm4, %v787_v19 }
 0x519   :  { %1266 = vmatprep.mubr.msk.bf16.mxu0 %vm1379_vm1, %v1378_v10 }
 0x5eb   :  { %v879_v35 = vpop.f32.mrb[12].mxu0 }
 0x5ec   :  { %v880_v36 = vadd.f32 %v879_v35, %v835_v25  ;;  %v1256_v37 = vpop.f32.mrb[13].mxu0 }
 0x5ed   :  { %v882_v38 = vpop.f32.mrb[14].mxu0 }
 0x5ee   :  { %v886_v39 = vmul.f32 0.70710677, %v880_v36  ;;  %v1257_v41 = vpop.f32.mrb[15].mxu0  ;;  %v885_v43 = vmul.f32 0.5, %v880_v36 }
 0x5f0   :  { %1364 = verf.f32 %v886_v39 }
 0x5fa   :  { %v1365_v42 = vpop.eup %1364 }
 0x5fb   :  { %v888_v44 = vadd.f32 1.0, %v1365_v42 }
 0x5fd   :  { %v889_v45 = vmul.f32 %v888_v44, %v885_v43  ;;  %v951_v43 = vld [vmem:[%s1768_s21] sm:$0xf]  ;;  %v1054_v44 = vpop.permute.xlu0 %1053 }
 0x5ff   :  { %v890_v46 = vpack.c.bf16 %v889_v45, %v889_v45 }
 0x601   :  { %v900_v47 = vsel %vm841_vm3, %v890_v46, 0 }
 0x602   :  { %1259 = vmatpush3.bf16.msra.mxu1 %v900_v47 }
 0x603   :  { %1270 = vmatprep.subr.bf16.mxu1 %v1378_v10 }
 0x605   :  { %1261 = vmatmul.mubr.msk.bf16.vlgmr.msra.gmra.mrb[12].mxu1 %vm837_vm4, %v789_v0 }
 0x606   :  { %1272 = vmatprep.mubr.msk.bf16.mxu1 %vm1379_vm1, %v1378_v10 }
 0x6d8   :  { %v936_v49 = vpop.f32.mrb[12].mxu1 }
 0x6d9   :  { %v937_v50 = vadd.f32 %v936_v49, %v894_v48  ;;  %v1262_v51 = vpop.f32.mrb[13].mxu1 }
 0x6da   :  { %v939_v52 = vpop.f32.mrb[14].mxu1 }
 0x6db   :  { %v942_v4 = vadd.f32 %v937_v50, %v1689_v62  ;;  %v1263_v53 = vpop.f32.mrb[15].mxu1 }
 0x6dd   :  { %v944_v54 = vmul.f32 0.70710677, %v942_v4  ;;  %v943_v7 = vmul.f32 0.5, %v942_v4 }
 0x6df   :  { %1366 = verf.f32 %v944_v54  ;;  %v1108_v54 = vld [vmem:[%s1769_s23] sm:$0xf] }
 0x6e9   :  { %v1367_v55 = vpop.eup %1366 }
 0x6ea   :  { %v946_v57 = vadd.f32 1.0, %v1367_v55  ;;  %v1114_v55 = vpop.permute.xlu1 %1113 }
 0x6ec   :  { %v947_v58 = vmul.f32 %v946_v57, %v943_v7 }
 0x6ee   :  { %v958_v60 = vmul.f32 %v956_v56, %v947_v58 }
 0x6f0   :  { %v963_v61 = vadd.f32 %v961_v59, %v958_v60 }
 0x6f2   :  { %v964_v63 = vrot.slane %v963_v61, 4 }
 0x6f4   :  { %v965_v1 = vadd.f32 %v964_v63, %v963_v61 }
 0x6f6   :  { %v966_v2 = vrot.slane %v965_v1, 2 }
 0x6f8   :  { %v967_v3 = vadd.f32 %v966_v2, %v965_v1 }
 0x6fa   :  { %v968_v5 = vrot.slane %v967_v3, 1 }
 0x6fc   :  { %v969_v8 = vadd.f32 %v968_v5, %v967_v3 }
 0x6fe   :  { %v970_v9 = vmul.f32 0.125, %v969_v8 }
 0x700   :  { %v971_v11 = vsub.f32 %v963_v61, %v970_v9 }
 0x702   :  { %v972_v62 = vmul.f32 %v971_v11, %v971_v11 }
 0x704   :  { %v973_v12 = vrot.slane %v972_v62, 4 }
 0x706   :  { %v974_v13 = vadd.f32 %v973_v12, %v972_v62 }
 0x708   :  { %v975_v14 = vrot.slane %v974_v13, 2 }
 0x70a   :  { %v976_v15 = vadd.f32 %v975_v14, %v974_v13 }
 0x70c   :  { %v977_v16 = vrot.slane %v976_v15, 1 }
 0x70e   :  { %v978_v17 = vadd.f32 %v977_v16, %v976_v15 }
 0x710   :  { %v979_v20 = vmul.f32 0.125, %v978_v17 }
 0x712   :  { %v980_v21 = vadd.f32 1e-05, %v979_v20 }
 0x714   :  { %1368 = vrsqrt.f32 %v980_v21 }
 0x71e   :  { %v1369_v22 = vpop.eup %1368 }
 0x71f   :  { %v982_v26 = vmul.f32 %v1369_v22, %v971_v11 }
 0x721   :  { %v987_v28 = vmul.f32 %v985_v23, %v982_v26 }
 0x723   :  { %v992_v29 = vadd.f32 %v990_v27, %v987_v28 }
 0x725   :  { %v993_v30 = vpack.c.bf16 %v992_v29, %v992_v29 }
 0x727   :  { %v1003_v31 = vsel %vm841_vm3, %v993_v30, 0 }
 0x728   :  { %1265 = vmatpush3.bf16.msra.mxu0 %v1003_v31 }
 0x729   :  { %1276 = vmatprep.subr.bf16.mxu0 %v1378_v10 }
 0x72b   :  { %1267 = vmatmul.mubr.msk.bf16.vlgmr.msra.gmra.mrb[16].mxu0 %vm837_vm4, %v949_v32 }
 0x72c   :  { %1278 = vmatprep.mubr.msk.bf16.mxu0 %vm1379_vm1, %v1378_v10 }
 0x7fe   :  { %v1039_v18 = vpop.f32.mrb[16].mxu0 }
 0x7ff   :  { %v1040_v19 = vadd.f32 %v1039_v18, %v997_v34  ;;  %v1268_v24 = vpop.f32.mrb[17].mxu0 }
 0x800   :  { %v1042_v25 = vpop.f32.mrb[18].mxu0 }
 0x801   :  { %v1046_v35 = vmul.f32 0.70710677, %v1040_v19  ;;  %v1269_v36 = vpop.f32.mrb[19].mxu0  ;;  %v1045_v38 = vmul.f32 0.5, %v1040_v19 }
 0x803   :  { %1370 = verf.f32 %v1046_v35 }
 0x80d   :  { %v1371_v37 = vpop.eup %1370 }
 0x80e   :  { %v1048_v39 = vadd.f32 1.0, %v1371_v37 }
 0x810   :  { %v1049_v41 = vmul.f32 %v1048_v39, %v1045_v38 }
 0x812   :  { %v1050_v42 = vpack.c.bf16 %v1049_v41, %v1049_v41 }
 0x814   :  { %v1060_v10 = vsel %vm841_vm3, %v1050_v42, 0 }
 0x815   :  { %1271 = vmatpush3.bf16.msra.mxu1 %v1060_v10 }
 0x818   :  { %1273 = vmatmul.mubr.msk.bf16.vlgmr.msra.gmra.mrb[16].mxu1 %vm837_vm4, %v951_v43 }
 0x8eb   :  { %v1096_v45 = vpop.f32.mrb[16].mxu1 }
 0x8ec   :  { %v1097_v46 = vadd.f32 %v1096_v45, %v1054_v44  ;;  %v1274_v47 = vpop.f32.mrb[17].mxu1 }
 0x8ed   :  { %v1099_v0 = vpop.f32.mrb[18].mxu1 }
 0x8ee   :  { %v1102_v6 = vadd.f32 %v1097_v46, %v947_v58  ;;  %v1275_v40 = vpop.f32.mrb[19].mxu1 }
 0x8f0   :  { %v1104_v48 = vmul.f32 0.70710677, %v1102_v6  ;;  %v1103_v50 = vmul.f32 0.5, %v1102_v6 }
 0x8f2   :  { %1372 = verf.f32 %v1104_v48 }
 0x8fc   :  { %v1373_v49 = vpop.eup %1372 }
 0x8fd   :  { %v1106_v51 = vadd.f32 1.0, %v1373_v49 }
 0x8ff   :  { %v1107_v52 = vmul.f32 %v1106_v51, %v1103_v50 }
 0x901   :  { %v1110_v4 = vpack.c.bf16 %v1107_v52, %v1107_v52 }
 0x903   :  { %v1120_v53 = vsel %vm841_vm3, %v1110_v4, 0 }
 0x904   :  { %1277 = vmatpush3.bf16.msra.mxu0 %v1120_v53 }
 0x907   :  { %1279 = vmatmul.mubr.msk.bf16.vlgmr.msra.gmra.mrb[20].mxu0 %vm837_vm4, %v1108_v54 }
 0x9da   :  { %v1156_v56 = vpop.f32.mrb[20].mxu0 }
 0x9db   :  { %v1157_v7 = vadd.f32 %v1156_v56, %v1114_v55  ;;  %v1280_v57 = vpop.f32.mrb[21].mxu0 }
 0x9dc   :  { %v1159_v58 = vpop.f32.mrb[22].mxu0 }
 0x9dd   :  { %1162 = vst [vmem:[%s1770_s25] sm:$0xff] %v1157_v7  ;;  %v1281_v59 = vpop.f32.mrb[23].mxu0 }

</bundles_post_ra>
